<compile_context>
chip_gen: v7x
topology: tpu7x:2x2x1
jax: 0.10.0
libtpu: 0.0.40
codegen_flags: <defaults>
</compile_context>

<pallas_src>
import jax
import jax.numpy as jnp
import numpy as np
from jax.experimental import pallas as pl
from jax.experimental.pallas import tpu as pltpu

# ---------------- configuration (small, consistent with the module) ----------------
CONFIG = dict(
    in_channels=1,          # EEG input has a single "image" channel
    channel_size=8,         # conv feature maps F
    temporal_conv_size=9,   # T
    spatial_conv_size=16,   # S (== number of electrodes -> collapses H)
    avg_kernel=8,
    avg_stride=4,
    dropout=0.5,
)
B, H, W = 2, 16, 64         # batch, electrodes, time samples
AVG_K = CONFIG["avg_kernel"]
AVG_S = CONFIG["avg_stride"]
BN_EPS = 1e-5


# ---------------------------------- kernel -----------------------------------------
def fused_kernel(x_ref, wt_ref, bt_ref, ws_ref, bs_ref, g_ref, b_ref, pool_ref, o_ref):
    """Temporal conv + spatial conv + BN(batch stats) + ELU + AvgPool for the whole batch."""
    x = x_ref[...]            # (B, C_in, H, W)
    wt = wt_ref[...]          # (F, C_in, T)
    bt = bt_ref[...]          # (F, 1)
    ws2 = ws_ref[...]         # (F, F*S)  spatial weight flattened: column = g*S + s
    bs = bs_ref[...]          # (F, 1)
    gamma = g_ref[...]        # (F, 1)
    beta = b_ref[...]         # (F, 1)
    pool = pool_ref[...]      # (W1, W2)  banded matrix with 1/AVG_K per window

    Bb, C_in, Hh, Ww = x.shape
    F, _, T = wt.shape
    W1 = Ww - T + 1           # temporal-conv output width; H == S => spatial output height 1

    # ---- conv stack, per batch element (B tiny, static unroll) ---------------------
    y2_rows = []
    for b in range(Bb):
        # temporal conv (1,T): pure-VPU broadcast FMAs (exact f32, no K=1 matmuls)
        acc1 = jnp.zeros((F, Hh, W1), jnp.float32)
        for c in range(C_in):
            xc = x[b, c]                                            # (H, W)
            for t in range(T):
                acc1 = acc1 + wt[:, c:c + 1, t:t + 1] * xc[None, :, t:t + W1]
        y1 = acc1 + bt[:, :, None]                                  # (F, H, W1)
        # spatial conv (S,1), H == S: single K = F*S MXU matmul
        y1_2d = y1.reshape(F * Hh, W1)                              # (F*S, W1), row = g*S + s
        y2_rows.append(
            jnp.dot(ws2, y1_2d, preferred_element_type=jnp.float32) + bs)   # (F, W1)

    # ---- BatchNorm2d, training-mode batch statistics (biased variance) -------------
    inv_n = 1.0 / float(Bb * W1)                                    # H2 == 1
    s1 = y2_rows[0]
    for b in range(1, Bb):
        s1 = s1 + y2_rows[b]
    mean = jnp.sum(s1, axis=1, keepdims=True) * inv_n               # (F, 1)
    sq = (y2_rows[0] - mean) ** 2
    for b in range(1, Bb):
        sq = sq + (y2_rows[b] - mean) ** 2
    var = jnp.sum(sq, axis=1, keepdims=True) * inv_n                # (F, 1)
    scale = gamma * jax.lax.rsqrt(var + BN_EPS)                     # (F, 1)
    shift = beta - mean * scale                                     # (F, 1)

    # ---- BN apply + ELU, stacked into a lane-dense 2-D slab ------------------------
    act_rows = []
    for b in range(Bb):
        xn = y2_rows[b] * scale + shift
        # ELU(alpha=1); clamp exp argument so the unselected branch stays finite.
        act_rows.append(jnp.where(xn > 0, xn, jnp.exp(jnp.minimum(xn, 0.0)) - 1.0))
    act2d = jnp.concatenate(act_rows, axis=0)                       # (B*F, W1)

    # ---- AvgPool2d((1,k),(1,s)) as one matmul against the banded pooling matrix ----
    o_ref[...] = jnp.dot(act2d, pool, preferred_element_type=jnp.float32)   # (B*F, W2)


# --------------------------------- wrapper ------------------------------------------
def shallow_net_forward(x, params):
    wt, bt, ws, bs, gamma, beta = params
    Bb, C_in, Hh, Ww = x.shape
    F, _, T = wt.shape
    S = ws.shape[-1]
    assert Hh == S, "spatial_conv_size must equal the electrode axis (module design)"
    W1 = Ww - T + 1
    H2 = Hh - S + 1            # == 1
    W2 = (W1 - AVG_K) // AVG_S + 1

    # host-side (free) reshapes so the kernel sees MXU/VPU-friendly 2-D operands
    ws2d = ws.reshape(F, F * S).astype(jnp.float32)   # column index = g*S + s
    bt2 = bt.reshape(F, 1).astype(jnp.float32)
    bs2 = bs.reshape(F, 1).astype(jnp.float32)
    g2 = gamma.reshape(F, 1).astype(jnp.float32)
    be2 = beta.reshape(F, 1).astype(jnp.float32)

    # constant banded pooling matrix: P[w, j] = 1/AVG_K iff j*AVG_S <= w < j*AVG_S+AVG_K
    pool_np = np.zeros((W1, W2), np.float32)
    for j in range(W2):
        pool_np[j * AVG_S: j * AVG_S + AVG_K, j] = 1.0 / AVG_K
    pool_mat = jnp.asarray(pool_np)

    out2d = pl.pallas_call(
        fused_kernel,
        out_shape=jax.ShapeDtypeStruct((Bb * F, W2), jnp.float32),
        grid_spec=pltpu.PrefetchScalarGridSpec(
            num_scalar_prefetch=0,
            grid=(1,),                                   # single block: everything VMEM-resident
            in_specs=[
                pl.BlockSpec((Bb, C_in, Hh, Ww), lambda i: (0, 0, 0, 0)),
                pl.BlockSpec((F, C_in, T), lambda i: (0, 0, 0)),
                pl.BlockSpec((F, 1), lambda i: (0, 0)),
                pl.BlockSpec((F, F * S), lambda i: (0, 0)),
                pl.BlockSpec((F, 1), lambda i: (0, 0)),
                pl.BlockSpec((F, 1), lambda i: (0, 0)),
                pl.BlockSpec((F, 1), lambda i: (0, 0)),
                pl.BlockSpec((W1, W2), lambda i: (0, 0)),
            ],
            out_specs=pl.BlockSpec((Bb * F, W2), lambda i: (0, 0)),
        ),
        compiler_params=pltpu.CompilerParams(dimension_semantics=("arbitrary",)),
    )(x.astype(jnp.float32), wt.astype(jnp.float32), bt2, ws2d, bs2, g2, be2, pool_mat)

    # Dropout: identity (eval mode).  Final reshape back to NCHW is metadata-only.
    return out2d.reshape(Bb, F, H2, W2)


# ------------------------------- reference (pure JAX) --------------------------------
def reference(x, params):
    wt, bt, ws, bs, gamma, beta = params
    F, C_in, T = wt.shape
    S = ws.shape[-1]
    wt4 = wt.reshape(F, C_in, 1, T)
    ws4 = ws.reshape(F, F, S, 1)
    dn = ("NCHW", "OIHW", "NCHW")
    y1 = jax.lax.conv_general_dilated(
        x, wt4, (1, 1), "VALID", dimension_numbers=dn,
        precision=jax.lax.Precision.HIGHEST) + bt[None, :, None, None]
    y2 = jax.lax.conv_general_dilated(
        y1, ws4, (1, 1), "VALID", dimension_numbers=dn,
        precision=jax.lax.Precision.HIGHEST) + bs[None, :, None, None]
    mean = y2.mean(axis=(0, 2, 3), keepdims=True)
    var = y2.var(axis=(0, 2, 3), keepdims=True)
    xn = (y2 - mean) / jnp.sqrt(var + BN_EPS)
    xn = xn * gamma[None, :, None, None] + beta[None, :, None, None]
    act = jnp.where(xn > 0, xn, jnp.exp(jnp.minimum(xn, 0.0)) - 1.0)
    W1 = act.shape[-1]
    W2 = (W1 - AVG_K) // AVG_S + 1
    return jnp.stack(
        [act[..., j * AVG_S: j * AVG_S + AVG_K].mean(-1) for j in range(W2)],
        axis=-1)


# ----------------------------------- main --------------------------------------------
if __name__ == "__main__":
    key = jax.random.PRNGKey(0)
    k_x, k_wt, k_bt, k_ws, k_bs, k_g, k_b = jax.random.split(key, 7)

    C_in = CONFIG["in_channels"]
    F = CONFIG["channel_size"]
    T = CONFIG["temporal_conv_size"]
    S = CONFIG["spatial_conv_size"]

    x = jax.random.normal(k_x, (B, C_in, H, W), jnp.float32)

    params = (
        0.1 * jax.random.normal(k_wt, (F, C_in, T), jnp.float32),   # temporal_conv.weight (F,C_in,1,T) squeezed
        0.1 * jax.random.normal(k_bt, (F,), jnp.float32),           # temporal_conv.bias
        0.1 * jax.random.normal(k_ws, (F, F, S), jnp.float32),      # spatial_conv.weight (F,F,S,1) squeezed
        0.1 * jax.random.normal(k_bs, (F,), jnp.float32),           # spatial_conv.bias
        1.0 + 0.1 * jax.random.normal(k_g, (F,), jnp.float32),      # bn.weight
        0.1 * jax.random.normal(k_b, (F,), jnp.float32),            # bn.bias
    )

    out = shallow_net_forward(x, params)
    out = jax.block_until_ready(out)

    ref = jax.block_until_ready(reference(x, params))
    # Tolerance 2e-3: reference convs use lax.Precision.HIGHEST while the in-kernel
    # MXU dots use Mosaic's default f32 matmul precision.
    np.testing.assert_allclose(np.asarray(out), np.asarray(ref), rtol=2e-3, atol=2e-3)

    print("KERNEL_OK")
</pallas_src>

<mosaic_0001>
module attributes {stable_mosaic.version = 11 : i64} {
  func.func @fused_kernel(%arg0: i32, %arg1: memref<2x1x16x64xf32, #tpu.memory_space<vmem>>, %arg2: memref<8x1x9xf32, #tpu.memory_space<vmem>>, %arg3: memref<8x1xf32, #tpu.memory_space<vmem>>, %arg4: memref<8x128xf32, #tpu.memory_space<vmem>>, %arg5: memref<8x1xf32, #tpu.memory_space<vmem>>, %arg6: memref<8x1xf32, #tpu.memory_space<vmem>>, %arg7: memref<8x1xf32, #tpu.memory_space<vmem>>, %arg8: memref<56x13xf32, #tpu.memory_space<vmem>>, %arg9: memref<16x13xf32, #tpu.memory_space<vmem>>) attributes {dimension_semantics = [#tpu.dimension_semantics<arbitrary>], iteration_bounds = array<i64: 1>, scalar_prefetch = 0 : i64, scratch_operands = 0 : i64, tpu.core_type = #tpu.core_type<tc>, window_params = [{pipeline_mode = #tpu.pipeline_mode<synchronous>, transform_indices = @transform_0, window_bounds = array<i64: 2, 1, 16, 64>}, {pipeline_mode = #tpu.pipeline_mode<synchronous>, transform_indices = @transform_1, window_bounds = array<i64: 8, 1, 9>}, {pipeline_mode = #tpu.pipeline_mode<synchronous>, transform_indices = @transform_2, window_bounds = array<i64: 8, 1>}, {pipeline_mode = #tpu.pipeline_mode<synchronous>, transform_indices = @transform_3, window_bounds = array<i64: 8, 128>}, {pipeline_mode = #tpu.pipeline_mode<synchronous>, transform_indices = @transform_4, window_bounds = array<i64: 8, 1>}, {pipeline_mode = #tpu.pipeline_mode<synchronous>, transform_indices = @transform_5, window_bounds = array<i64: 8, 1>}, {pipeline_mode = #tpu.pipeline_mode<synchronous>, transform_indices = @transform_6, window_bounds = array<i64: 8, 1>}, {pipeline_mode = #tpu.pipeline_mode<synchronous>, transform_indices = @transform_7, window_bounds = array<i64: 56, 13>}, {pipeline_mode = #tpu.pipeline_mode<synchronous>, transform_indices = @transform_8, window_bounds = array<i64: 16, 13>}]} {
    %c0 = arith.constant 0 : index
    %c0_0 = arith.constant 0 : index
    %c0_1 = arith.constant 0 : index
    %c0_2 = arith.constant 0 : index
    %0 = vector.load %arg1[%c0, %c0_0, %c0_1, %c0_2] : memref<2x1x16x64xf32, #tpu.memory_space<vmem>>, vector<2x1x16x64xf32>
    %c0_3 = arith.constant 0 : index
    %c0_4 = arith.constant 0 : index
    %c0_5 = arith.constant 0 : index
    %1 = vector.load %arg2[%c0_3, %c0_4, %c0_5] : memref<8x1x9xf32, #tpu.memory_space<vmem>>, vector<8x1x9xf32>
    %c0_6 = arith.constant 0 : index
    %c0_7 = arith.constant 0 : index
    %2 = vector.load %arg3[%c0_6, %c0_7] : memref<8x1xf32, #tpu.memory_space<vmem>>, vector<8x1xf32>
    %c0_8 = arith.constant 0 : index
    %c0_9 = arith.constant 0 : index
    %3 = vector.load %arg4[%c0_8, %c0_9] : memref<8x128xf32, #tpu.memory_space<vmem>>, vector<8x128xf32>
    %c0_10 = arith.constant 0 : index
    %c0_11 = arith.constant 0 : index
    %4 = vector.load %arg5[%c0_10, %c0_11] : memref<8x1xf32, #tpu.memory_space<vmem>>, vector<8x1xf32>
    %c0_12 = arith.constant 0 : index
    %c0_13 = arith.constant 0 : index
    %5 = vector.load %arg6[%c0_12, %c0_13] : memref<8x1xf32, #tpu.memory_space<vmem>>, vector<8x1xf32>
    %c0_14 = arith.constant 0 : index
    %c0_15 = arith.constant 0 : index
    %6 = vector.load %arg7[%c0_14, %c0_15] : memref<8x1xf32, #tpu.memory_space<vmem>>, vector<8x1xf32>
    %c0_16 = arith.constant 0 : index
    %c0_17 = arith.constant 0 : index
    %7 = vector.load %arg8[%c0_16, %c0_17] : memref<56x13xf32, #tpu.memory_space<vmem>>, vector<56x13xf32>
    %cst = arith.constant 0.000000e+00 : f32
    %8 = vector.broadcast %cst : f32 to vector<8x16x56xf32>
    %9 = vector.extract_strided_slice %0 {offsets = [0, 0, 0, 0], sizes = [1, 1, 16, 64], strides = [1, 1, 1, 1]} : vector<2x1x16x64xf32> to vector<1x1x16x64xf32>
    %10 = vector.shape_cast %9 : vector<1x1x16x64xf32> to vector<16x64xf32>
    %11 = vector.extract_strided_slice %1 {offsets = [0, 0, 0], sizes = [8, 1, 1], strides = [1, 1, 1]} : vector<8x1x9xf32> to vector<8x1x1xf32>
    %12 = vector.extract_strided_slice %10 {offsets = [0, 0], sizes = [16, 56], strides = [1, 1]} : vector<16x64xf32> to vector<16x56xf32>
    %13 = vector.shape_cast %12 : vector<16x56xf32> to vector<1x16x56xf32>
    %14 = vector.broadcast %11 : vector<8x1x1xf32> to vector<8x16x56xf32>
    %15 = vector.broadcast %13 : vector<1x16x56xf32> to vector<8x16x56xf32>
    %16 = arith.mulf %14, %15 : vector<8x16x56xf32>
    %17 = arith.addf %8, %16 : vector<8x16x56xf32>
    %18 = vector.extract_strided_slice %1 {offsets = [0, 0, 1], sizes = [8, 1, 1], strides = [1, 1, 1]} : vector<8x1x9xf32> to vector<8x1x1xf32>
    %19 = vector.extract_strided_slice %10 {offsets = [0, 1], sizes = [16, 56], strides = [1, 1]} : vector<16x64xf32> to vector<16x56xf32>
    %20 = vector.shape_cast %19 : vector<16x56xf32> to vector<1x16x56xf32>
    %21 = vector.broadcast %18 : vector<8x1x1xf32> to vector<8x16x56xf32>
    %22 = vector.broadcast %20 : vector<1x16x56xf32> to vector<8x16x56xf32>
    %23 = arith.mulf %21, %22 : vector<8x16x56xf32>
    %24 = arith.addf %17, %23 : vector<8x16x56xf32>
    %25 = vector.extract_strided_slice %1 {offsets = [0, 0, 2], sizes = [8, 1, 1], strides = [1, 1, 1]} : vector<8x1x9xf32> to vector<8x1x1xf32>
    %26 = vector.extract_strided_slice %10 {offsets = [0, 2], sizes = [16, 56], strides = [1, 1]} : vector<16x64xf32> to vector<16x56xf32>
    %27 = vector.shape_cast %26 : vector<16x56xf32> to vector<1x16x56xf32>
    %28 = vector.broadcast %25 : vector<8x1x1xf32> to vector<8x16x56xf32>
    %29 = vector.broadcast %27 : vector<1x16x56xf32> to vector<8x16x56xf32>
    %30 = arith.mulf %28, %29 : vector<8x16x56xf32>
    %31 = arith.addf %24, %30 : vector<8x16x56xf32>
    %32 = vector.extract_strided_slice %1 {offsets = [0, 0, 3], sizes = [8, 1, 1], strides = [1, 1, 1]} : vector<8x1x9xf32> to vector<8x1x1xf32>
    %33 = vector.extract_strided_slice %10 {offsets = [0, 3], sizes = [16, 56], strides = [1, 1]} : vector<16x64xf32> to vector<16x56xf32>
    %34 = vector.shape_cast %33 : vector<16x56xf32> to vector<1x16x56xf32>
    %35 = vector.broadcast %32 : vector<8x1x1xf32> to vector<8x16x56xf32>
    %36 = vector.broadcast %34 : vector<1x16x56xf32> to vector<8x16x56xf32>
    %37 = arith.mulf %35, %36 : vector<8x16x56xf32>
    %38 = arith.addf %31, %37 : vector<8x16x56xf32>
    %39 = vector.extract_strided_slice %1 {offsets = [0, 0, 4], sizes = [8, 1, 1], strides = [1, 1, 1]} : vector<8x1x9xf32> to vector<8x1x1xf32>
    %40 = vector.extract_strided_slice %10 {offsets = [0, 4], sizes = [16, 56], strides = [1, 1]} : vector<16x64xf32> to vector<16x56xf32>
    %41 = vector.shape_cast %40 : vector<16x56xf32> to vector<1x16x56xf32>
    %42 = vector.broadcast %39 : vector<8x1x1xf32> to vector<8x16x56xf32>
    %43 = vector.broadcast %41 : vector<1x16x56xf32> to vector<8x16x56xf32>
    %44 = arith.mulf %42, %43 : vector<8x16x56xf32>
    %45 = arith.addf %38, %44 : vector<8x16x56xf32>
    %46 = vector.extract_strided_slice %1 {offsets = [0, 0, 5], sizes = [8, 1, 1], strides = [1, 1, 1]} : vector<8x1x9xf32> to vector<8x1x1xf32>
    %47 = vector.extract_strided_slice %10 {offsets = [0, 5], sizes = [16, 56], strides = [1, 1]} : vector<16x64xf32> to vector<16x56xf32>
    %48 = vector.shape_cast %47 : vector<16x56xf32> to vector<1x16x56xf32>
    %49 = vector.broadcast %46 : vector<8x1x1xf32> to vector<8x16x56xf32>
    %50 = vector.broadcast %48 : vector<1x16x56xf32> to vector<8x16x56xf32>
    %51 = arith.mulf %49, %50 : vector<8x16x56xf32>
    %52 = arith.addf %45, %51 : vector<8x16x56xf32>
    %53 = vector.extract_strided_slice %1 {offsets = [0, 0, 6], sizes = [8, 1, 1], strides = [1, 1, 1]} : vector<8x1x9xf32> to vector<8x1x1xf32>
    %54 = vector.extract_strided_slice %10 {offsets = [0, 6], sizes = [16, 56], strides = [1, 1]} : vector<16x64xf32> to vector<16x56xf32>
    %55 = vector.shape_cast %54 : vector<16x56xf32> to vector<1x16x56xf32>
    %56 = vector.broadcast %53 : vector<8x1x1xf32> to vector<8x16x56xf32>
    %57 = vector.broadcast %55 : vector<1x16x56xf32> to vector<8x16x56xf32>
    %58 = arith.mulf %56, %57 : vector<8x16x56xf32>
    %59 = arith.addf %52, %58 : vector<8x16x56xf32>
    %60 = vector.extract_strided_slice %1 {offsets = [0, 0, 7], sizes = [8, 1, 1], strides = [1, 1, 1]} : vector<8x1x9xf32> to vector<8x1x1xf32>
    %61 = vector.extract_strided_slice %10 {offsets = [0, 7], sizes = [16, 56], strides = [1, 1]} : vector<16x64xf32> to vector<16x56xf32>
    %62 = vector.shape_cast %61 : vector<16x56xf32> to vector<1x16x56xf32>
    %63 = vector.broadcast %60 : vector<8x1x1xf32> to vector<8x16x56xf32>
    %64 = vector.broadcast %62 : vector<1x16x56xf32> to vector<8x16x56xf32>
    %65 = arith.mulf %63, %64 : vector<8x16x56xf32>
    %66 = arith.addf %59, %65 : vector<8x16x56xf32>
    %67 = vector.extract_strided_slice %1 {offsets = [0, 0, 8], sizes = [8, 1, 1], strides = [1, 1, 1]} : vector<8x1x9xf32> to vector<8x1x1xf32>
    %68 = vector.extract_strided_slice %10 {offsets = [0, 8], sizes = [16, 56], strides = [1, 1]} : vector<16x64xf32> to vector<16x56xf32>
    %69 = vector.shape_cast %68 : vector<16x56xf32> to vector<1x16x56xf32>
    %70 = vector.broadcast %67 : vector<8x1x1xf32> to vector<8x16x56xf32>
    %71 = vector.broadcast %69 : vector<1x16x56xf32> to vector<8x16x56xf32>
    %72 = arith.mulf %70, %71 : vector<8x16x56xf32>
    %73 = arith.addf %66, %72 : vector<8x16x56xf32>
    %74 = vector.shape_cast %2 : vector<8x1xf32> to vector<8x1x1xf32>
    %75 = vector.broadcast %74 : vector<8x1x1xf32> to vector<8x16x56xf32>
    %76 = arith.addf %73, %75 : vector<8x16x56xf32>
    %77 = vector.shape_cast %76 : vector<8x16x56xf32> to vector<128x56xf32>
    %cst_18 = arith.constant dense<0.000000e+00> : vector<8x56xf32>
    %78 = tpu.matmul %3, %77, %cst_18 {dimension_numbers = #tpu.dot_dimension_numbers<[1], [0], [0], [1], [0, 0, 1, 1], [], []>} : vector<8x128xf32>, vector<128x56xf32>, vector<8x56xf32> -> vector<8x56xf32>
    %79 = vector.broadcast %4 : vector<8x1xf32> to vector<8x56xf32>
    %80 = arith.addf %78, %79 : vector<8x56xf32>
    %cst_19 = arith.constant 0.000000e+00 : f32
    %81 = vector.broadcast %cst_19 : f32 to vector<8x16x56xf32>
    %82 = vector.extract_strided_slice %0 {offsets = [1, 0, 0, 0], sizes = [1, 1, 16, 64], strides = [1, 1, 1, 1]} : vector<2x1x16x64xf32> to vector<1x1x16x64xf32>
    %83 = vector.shape_cast %82 : vector<1x1x16x64xf32> to vector<16x64xf32>
    %84 = vector.extract_strided_slice %1 {offsets = [0, 0, 0], sizes = [8, 1, 1], strides = [1, 1, 1]} : vector<8x1x9xf32> to vector<8x1x1xf32>
    %85 = vector.extract_strided_slice %83 {offsets = [0, 0], sizes = [16, 56], strides = [1, 1]} : vector<16x64xf32> to vector<16x56xf32>
    %86 = vector.shape_cast %85 : vector<16x56xf32> to vector<1x16x56xf32>
    %87 = vector.broadcast %84 : vector<8x1x1xf32> to vector<8x16x56xf32>
    %88 = vector.broadcast %86 : vector<1x16x56xf32> to vector<8x16x56xf32>
    %89 = arith.mulf %87, %88 : vector<8x16x56xf32>
    %90 = arith.addf %81, %89 : vector<8x16x56xf32>
    %91 = vector.extract_strided_slice %1 {offsets = [0, 0, 1], sizes = [8, 1, 1], strides = [1, 1, 1]} : vector<8x1x9xf32> to vector<8x1x1xf32>
    %92 = vector.extract_strided_slice %83 {offsets = [0, 1], sizes = [16, 56], strides = [1, 1]} : vector<16x64xf32> to vector<16x56xf32>
    %93 = vector.shape_cast %92 : vector<16x56xf32> to vector<1x16x56xf32>
    %94 = vector.broadcast %91 : vector<8x1x1xf32> to vector<8x16x56xf32>
    %95 = vector.broadcast %93 : vector<1x16x56xf32> to vector<8x16x56xf32>
    %96 = arith.mulf %94, %95 : vector<8x16x56xf32>
    %97 = arith.addf %90, %96 : vector<8x16x56xf32>
    %98 = vector.extract_strided_slice %1 {offsets = [0, 0, 2], sizes = [8, 1, 1], strides = [1, 1, 1]} : vector<8x1x9xf32> to vector<8x1x1xf32>
    %99 = vector.extract_strided_slice %83 {offsets = [0, 2], sizes = [16, 56], strides = [1, 1]} : vector<16x64xf32> to vector<16x56xf32>
    %100 = vector.shape_cast %99 : vector<16x56xf32> to vector<1x16x56xf32>
    %101 = vector.broadcast %98 : vector<8x1x1xf32> to vector<8x16x56xf32>
    %102 = vector.broadcast %100 : vector<1x16x56xf32> to vector<8x16x56xf32>
    %103 = arith.mulf %101, %102 : vector<8x16x56xf32>
    %104 = arith.addf %97, %103 : vector<8x16x56xf32>
    %105 = vector.extract_strided_slice %1 {offsets = [0, 0, 3], sizes = [8, 1, 1], strides = [1, 1, 1]} : vector<8x1x9xf32> to vector<8x1x1xf32>
    %106 = vector.extract_strided_slice %83 {offsets = [0, 3], sizes = [16, 56], strides = [1, 1]} : vector<16x64xf32> to vector<16x56xf32>
    %107 = vector.shape_cast %106 : vector<16x56xf32> to vector<1x16x56xf32>
    %108 = vector.broadcast %105 : vector<8x1x1xf32> to vector<8x16x56xf32>
    %109 = vector.broadcast %107 : vector<1x16x56xf32> to vector<8x16x56xf32>
    %110 = arith.mulf %108, %109 : vector<8x16x56xf32>
    %111 = arith.addf %104, %110 : vector<8x16x56xf32>
    %112 = vector.extract_strided_slice %1 {offsets = [0, 0, 4], sizes = [8, 1, 1], strides = [1, 1, 1]} : vector<8x1x9xf32> to vector<8x1x1xf32>
    %113 = vector.extract_strided_slice %83 {offsets = [0, 4], sizes = [16, 56], strides = [1, 1]} : vector<16x64xf32> to vector<16x56xf32>
    %114 = vector.shape_cast %113 : vector<16x56xf32> to vector<1x16x56xf32>
    %115 = vector.broadcast %112 : vector<8x1x1xf32> to vector<8x16x56xf32>
    %116 = vector.broadcast %114 : vector<1x16x56xf32> to vector<8x16x56xf32>
    %117 = arith.mulf %115, %116 : vector<8x16x56xf32>
    %118 = arith.addf %111, %117 : vector<8x16x56xf32>
    %119 = vector.extract_strided_slice %1 {offsets = [0, 0, 5], sizes = [8, 1, 1], strides = [1, 1, 1]} : vector<8x1x9xf32> to vector<8x1x1xf32>
    %120 = vector.extract_strided_slice %83 {offsets = [0, 5], sizes = [16, 56], strides = [1, 1]} : vector<16x64xf32> to vector<16x56xf32>
    %121 = vector.shape_cast %120 : vector<16x56xf32> to vector<1x16x56xf32>
    %122 = vector.broadcast %119 : vector<8x1x1xf32> to vector<8x16x56xf32>
    %123 = vector.broadcast %121 : vector<1x16x56xf32> to vector<8x16x56xf32>
    %124 = arith.mulf %122, %123 : vector<8x16x56xf32>
    %125 = arith.addf %118, %124 : vector<8x16x56xf32>
    %126 = vector.extract_strided_slice %1 {offsets = [0, 0, 6], sizes = [8, 1, 1], strides = [1, 1, 1]} : vector<8x1x9xf32> to vector<8x1x1xf32>
    %127 = vector.extract_strided_slice %83 {offsets = [0, 6], sizes = [16, 56], strides = [1, 1]} : vector<16x64xf32> to vector<16x56xf32>
    %128 = vector.shape_cast %127 : vector<16x56xf32> to vector<1x16x56xf32>
    %129 = vector.broadcast %126 : vector<8x1x1xf32> to vector<8x16x56xf32>
    %130 = vector.broadcast %128 : vector<1x16x56xf32> to vector<8x16x56xf32>
    %131 = arith.mulf %129, %130 : vector<8x16x56xf32>
    %132 = arith.addf %125, %131 : vector<8x16x56xf32>
    %133 = vector.extract_strided_slice %1 {offsets = [0, 0, 7], sizes = [8, 1, 1], strides = [1, 1, 1]} : vector<8x1x9xf32> to vector<8x1x1xf32>
    %134 = vector.extract_strided_slice %83 {offsets = [0, 7], sizes = [16, 56], strides = [1, 1]} : vector<16x64xf32> to vector<16x56xf32>
    %135 = vector.shape_cast %134 : vector<16x56xf32> to vector<1x16x56xf32>
    %136 = vector.broadcast %133 : vector<8x1x1xf32> to vector<8x16x56xf32>
    %137 = vector.broadcast %135 : vector<1x16x56xf32> to vector<8x16x56xf32>
    %138 = arith.mulf %136, %137 : vector<8x16x56xf32>
    %139 = arith.addf %132, %138 : vector<8x16x56xf32>
    %140 = vector.extract_strided_slice %1 {offsets = [0, 0, 8], sizes = [8, 1, 1], strides = [1, 1, 1]} : vector<8x1x9xf32> to vector<8x1x1xf32>
    %141 = vector.extract_strided_slice %83 {offsets = [0, 8], sizes = [16, 56], strides = [1, 1]} : vector<16x64xf32> to vector<16x56xf32>
    %142 = vector.shape_cast %141 : vector<16x56xf32> to vector<1x16x56xf32>
    %143 = vector.broadcast %140 : vector<8x1x1xf32> to vector<8x16x56xf32>
    %144 = vector.broadcast %142 : vector<1x16x56xf32> to vector<8x16x56xf32>
    %145 = arith.mulf %143, %144 : vector<8x16x56xf32>
    %146 = arith.addf %139, %145 : vector<8x16x56xf32>
    %147 = vector.shape_cast %2 : vector<8x1xf32> to vector<8x1x1xf32>
    %148 = vector.broadcast %147 : vector<8x1x1xf32> to vector<8x16x56xf32>
    %149 = arith.addf %146, %148 : vector<8x16x56xf32>
    %150 = vector.shape_cast %149 : vector<8x16x56xf32> to vector<128x56xf32>
    %cst_20 = arith.constant dense<0.000000e+00> : vector<8x56xf32>
    %151 = tpu.matmul %3, %150, %cst_20 {dimension_numbers = #tpu.dot_dimension_numbers<[1], [0], [0], [1], [0, 0, 1, 1], [], []>} : vector<8x128xf32>, vector<128x56xf32>, vector<8x56xf32> -> vector<8x56xf32>
    %152 = vector.broadcast %4 : vector<8x1xf32> to vector<8x56xf32>
    %153 = arith.addf %151, %152 : vector<8x56xf32>
    %154 = arith.addf %80, %153 : vector<8x56xf32>
    %cst_21 = arith.constant dense<0.000000e+00> : vector<8xf32>
    %155 = vector.multi_reduction <add>, %154, %cst_21 [1] : vector<8x56xf32> to vector<8xf32>
    %156 = vector.shape_cast %155 : vector<8xf32> to vector<8x1xf32>
    %cst_22 = arith.constant 0.00892857183 : f32
    %157 = vector.broadcast %cst_22 : f32 to vector<8x1xf32>
    %158 = arith.mulf %156, %157 : vector<8x1xf32>
    %159 = vector.broadcast %158 : vector<8x1xf32> to vector<8x56xf32>
    %160 = arith.subf %80, %159 : vector<8x56xf32>
    %161 = arith.mulf %160, %160 : vector<8x56xf32>
    %162 = vector.broadcast %158 : vector<8x1xf32> to vector<8x56xf32>
    %163 = arith.subf %153, %162 : vector<8x56xf32>
    %164 = arith.mulf %163, %163 : vector<8x56xf32>
    %165 = arith.addf %161, %164 : vector<8x56xf32>
    %cst_23 = arith.constant dense<0.000000e+00> : vector<8xf32>
    %166 = vector.multi_reduction <add>, %165, %cst_23 [1] : vector<8x56xf32> to vector<8xf32>
    %167 = vector.shape_cast %166 : vector<8xf32> to vector<8x1xf32>
    %cst_24 = arith.constant 0.00892857183 : f32
    %168 = vector.broadcast %cst_24 : f32 to vector<8x1xf32>
    %169 = arith.mulf %167, %168 : vector<8x1xf32>
    %cst_25 = arith.constant 9.99999974E-6 : f32
    %170 = vector.broadcast %cst_25 : f32 to vector<8x1xf32>
    %171 = arith.addf %169, %170 : vector<8x1xf32>
    %172 = math.rsqrt %171 : vector<8x1xf32>
    %173 = arith.mulf %5, %172 : vector<8x1xf32>
    %174 = arith.mulf %158, %173 : vector<8x1xf32>
    %175 = arith.subf %6, %174 : vector<8x1xf32>
    %176 = vector.broadcast %173 : vector<8x1xf32> to vector<8x56xf32>
    %177 = arith.mulf %80, %176 : vector<8x56xf32>
    %178 = vector.broadcast %175 : vector<8x1xf32> to vector<8x56xf32>
    %179 = arith.addf %177, %178 : vector<8x56xf32>
    %cst_26 = arith.constant 0.000000e+00 : f32
    %180 = vector.broadcast %cst_26 : f32 to vector<8x56xf32>
    %181 = arith.cmpf ogt, %179, %180 : vector<8x56xf32>
    %cst_27 = arith.constant 0.000000e+00 : f32
    %182 = vector.broadcast %cst_27 : f32 to vector<8x56xf32>
    %183 = arith.minimumf %179, %182 : vector<8x56xf32>
    %184 = math.exp %183 : vector<8x56xf32>
    %cst_28 = arith.constant 1.000000e+00 : f32
    %185 = vector.broadcast %cst_28 : f32 to vector<8x56xf32>
    %186 = arith.subf %184, %185 : vector<8x56xf32>
    %187 = arith.select %181, %179, %186 : vector<8x56xi1>, vector<8x56xf32>
    %188 = vector.broadcast %173 : vector<8x1xf32> to vector<8x56xf32>
    %189 = arith.mulf %153, %188 : vector<8x56xf32>
    %190 = vector.broadcast %175 : vector<8x1xf32> to vector<8x56xf32>
    %191 = arith.addf %189, %190 : vector<8x56xf32>
    %cst_29 = arith.constant 0.000000e+00 : f32
    %192 = vector.broadcast %cst_29 : f32 to vector<8x56xf32>
    %193 = arith.cmpf ogt, %191, %192 : vector<8x56xf32>
    %cst_30 = arith.constant 0.000000e+00 : f32
    %194 = vector.broadcast %cst_30 : f32 to vector<8x56xf32>
    %195 = arith.minimumf %191, %194 : vector<8x56xf32>
    %196 = math.exp %195 : vector<8x56xf32>
    %cst_31 = arith.constant 1.000000e+00 : f32
    %197 = vector.broadcast %cst_31 : f32 to vector<8x56xf32>
    %198 = arith.subf %196, %197 : vector<8x56xf32>
    %199 = arith.select %193, %191, %198 : vector<8x56xi1>, vector<8x56xf32>
    %200 = tpu.concatenate %187, %199 in 0 : vector<8x56xf32>, vector<8x56xf32> -> vector<16x56xf32>
    %cst_32 = arith.constant dense<0.000000e+00> : vector<16x13xf32>
    %201 = tpu.matmul %200, %7, %cst_32 {dimension_numbers = #tpu.dot_dimension_numbers<[1], [0], [0], [1], [0, 0, 1, 1], [], []>} : vector<16x56xf32>, vector<56x13xf32>, vector<16x13xf32> -> vector<16x13xf32>
    %c0_33 = arith.constant 0 : index
    %c0_34 = arith.constant 0 : index
    %202 = vector.load %arg9[%c0_33, %c0_34] : memref<16x13xf32, #tpu.memory_space<vmem>>, vector<16x13xf32>
    tpu.vector_store %arg9[%c0_33, %c0_34], %201 {strides = array<i32>} : memref<16x13xf32, #tpu.memory_space<vmem>>, vector<16x13xf32>,
    return
  }
  func.func @transform_0(%arg0: i32) -> (i32, i32, i32, i32) {
    %c0_i32 = arith.constant 0 : i32
    %c0_i32_0 = arith.constant 0 : i32
    %c0_i32_1 = arith.constant 0 : i32
    %c0_i32_2 = arith.constant 0 : i32
    %c0_i32_3 = arith.constant 0 : i32
    return %c0_i32, %c0_i32_0, %c0_i32_1, %c0_i32_2 : i32, i32, i32, i32
  }
  func.func @transform_1(%arg0: i32) -> (i32, i32, i32) {
    %c0_i32 = arith.constant 0 : i32
    %c0_i32_0 = arith.constant 0 : i32
    %c0_i32_1 = arith.constant 0 : i32
    %c0_i32_2 = arith.constant 0 : i32
    return %c0_i32, %c0_i32_0, %c0_i32_1 : i32, i32, i32
  }
  func.func @transform_2(%arg0: i32) -> (i32, i32) {
    %c0_i32 = arith.constant 0 : i32
    %c0_i32_0 = arith.constant 0 : i32
    %c0_i32_1 = arith.constant 0 : i32
    return %c0_i32, %c0_i32_0 : i32, i32
  }
  func.func @transform_3(%arg0: i32) -> (i32, i32) {
    %c0_i32 = arith.constant 0 : i32
    %c0_i32_0 = arith.constant 0 : i32
    %c0_i32_1 = arith.constant 0 : i32
    return %c0_i32, %c0_i32_0 : i32, i32
  }
  func.func @transform_4(%arg0: i32) -> (i32, i32) {
    %c0_i32 = arith.constant 0 : i32
    %c0_i32_0 = arith.constant 0 : i32
    %c0_i32_1 = arith.constant 0 : i32
    return %c0_i32, %c0_i32_0 : i32, i32
  }
  func.func @transform_5(%arg0: i32) -> (i32, i32) {
    %c0_i32 = arith.constant 0 : i32
    %c0_i32_0 = arith.constant 0 : i32
    %c0_i32_1 = arith.constant 0 : i32
    return %c0_i32, %c0_i32_0 : i32, i32
  }
  func.func @transform_6(%arg0: i32) -> (i32, i32) {
    %c0_i32 = arith.constant 0 : i32
    %c0_i32_0 = arith.constant 0 : i32
    %c0_i32_1 = arith.constant 0 : i32
    return %c0_i32, %c0_i32_0 : i32, i32
  }
  func.func @transform_7(%arg0: i32) -> (i32, i32) {
    %c0_i32 = arith.constant 0 : i32
    %c0_i32_0 = arith.constant 0 : i32
    %c0_i32_1 = arith.constant 0 : i32
    return %c0_i32, %c0_i32_0 : i32, i32
  }
  func.func @transform_8(%arg0: i32) -> (i32, i32) {
    %c0_i32 = arith.constant 0 : i32
    %c0_i32_0 = arith.constant 0 : i32
    %c0_i32_1 = arith.constant 0 : i32
    return %c0_i32, %c0_i32_0 : i32, i32
  }
}

</mosaic_0001>

<bundles_post_ra>
// kernel: tpu_custom_call.1
= control target key start
LH: loop header
LB: loop body
LE: loop exit
PB: predicated region body
PF: predicated region fallthrough
CT: control target
= control target key end

     0   :  { %v2739_v2 = vmov 5   ;;  %v2740_v3 = vmov 0   ;;  %s4761_s0 = inlined_call_operand.vmem [shape: f32[2,1,16,64], index: 0, kind: input, shape index: {}]   ;;  %s4762_s1 = inlined_call_operand.vmem [shape: f32[8,1,9], index: 1, kind: input, shape index: {}]   ;;  %s4763_s2 = inlined_call_operand.vmem [shape: f32[8,1], index: 2, kind: input, shape index: {}]   ;;  %s4764_s3 = inlined_call_operand.vmem [shape: f32[8,128], index: 3, kind: input, shape index: {}]   ;;  %s4765_s4 = inlined_call_operand.vmem [shape: f32[8,1], index: 4, kind: input, shape index: {}]   ;;  %s4766_s5 = inlined_call_operand.vmem [shape: f32[8,1], index: 5, kind: input, shape index: {}]   ;;  %s4767_s6 = inlined_call_operand.vmem [shape: f32[8,1], index: 6, kind: input, shape index: {}]   ;;  %s4768_s7 = inlined_call_operand.vmem [shape: f32[56,13], index: 7, kind: input, shape index: {}]   ;;  %s4769_s8 = inlined_call_operand.hbm [shape: f32[16,13], index: 8, kind: output, shape index: {}]  }
   0x1   :  { %v2811_v0 = vld [vmem:[%s4762_s1 + $0x3] ss:$0 sm:$0xff]  ;;  %v2816_v1 = vld [vmem:[%s4762_s1 + $0x2] ss:$0 sm:$0xff]  ;;  %2666 = vset.pattern.permute.xlu0 %v2739_v2  ;;  %2645 = vset.pattern.permute.xlu1 %v2740_v3  ;;  %v2825_v4 = vld [vmem:[%s4762_s1 + $0x4] ss:$0 sm:$0xff] }
   0x2   :  { %683 = vperm.xlu0 %2666, %v2811_v0   ;;  %103 = vperm.xlu1 %2645, %v2816_v1  }
   0x3   :  { %13 = vsyncpa [#allocation3], 0  ;;  %v2741_v5 = vmov 4   ;;  %v2833_v6 = vld [vmem:[%s4762_s1] ss:$0 sm:$0xff]  ;;  %v2742_v7 = vmov 2   ;;  %v1187_v57 = vlaneseq }
   0x4   :  { %v2743_v8 = vmov 1   ;;  %v2842_v9 = vld [vmem:[%s4762_s1 + $0x1] ss:$0 sm:$0xff]  ;;  %v2853_v10 = vld [vmem:[%s4762_s1 + $0x6] ss:$0 sm:$0xff]  ;;  %v2744_v11 = vmov 3  }
   0x5   :  { %v2745_v12 = vmov 6   ;;  %v2876_v13 = vld [vmem:[%s4762_s1 + $0x7] ss:$0 sm:$0xff]  ;;  %v2746_v14 = vmov 7   ;;  %v2890_v15 = vld [vmem:[%s4762_s1 + $0x5] ss:$0 sm:$0xff] }
   0x6   :  { %2669 = vset.pattern.permute.xlu0 %v2741_v5  ;;  %107 = vperm.xlu1 %2645, %v2811_v0   ;;  %v2747_v16 = vmov 8   ;;  %v2951_v23 = vld [vmem:[%s4761_s0 + $0x10] sm:$0xff]  ;;  %s2748_s23 = smov 127   ;;  %v2965_v27 = vld [vmem:[%s4761_s0] sm:$0xff]  ;;  %s2749_s26 = smov 126   ;;  %v1188_v62 = vshrl.u32 %v1187_v57, 7 }
   0x7   :  { %559 = vperm.xlu0 %2669, %v2825_v4   ;;  %s2750_s27 = smov 125   ;;  %s2751_s28 = smov 124   ;;  %v2752_v55 = vmov 1966171168   ;;  %vm2758_vm0 = vmmov 0   ;;  %vm2274_vm1 = vcmask 457728  }
   0x8   :  { %v1185_v56 = vunpack.c.l.s4 %v2752_v55  ;;  %s2753_s29 = smov 123   ;;  %v3140_v55 = vld [vmem:[%s4761_s0 + $0x18] sm:$0xff]  ;;  %s2754_s14 = smov 122   ;;  %vm2400_vm4 = vcmask 105472  }
   0x9   :  { %s2755_s15 = smov 121   ;;  %s2756_s16 = smov 120  }
   0xa   :  { %2646 = vset.pattern.permute.xlu1 %v2742_v7  ;;  %v1186_v61 = vunpack.c.0.s8 %v1185_v56 }
   0xb   :  { %2670 = vset.pattern.permute.xlu0 %v2743_v8  ;;  %287 = vperm.xlu1 %2646, %v2833_v6  }
   0xc   :  { %159 = vperm.xlu0 %2670, %v2833_v6  }
   0xf   :  { %2647 = vset.pattern.permute.xlu1 %v2743_v8 }
  0x10   :  { %167 = vperm.xlu0 %2670, %v2816_v1   ;;  %163 = vperm.xlu1 %2647, %v2842_v9  }
  0x14   :  { %171 = vperm.xlu0 %2670, %v2811_v0   ;;  %2648 = vset.pattern.permute.xlu1 %v2742_v7 }
  0x15   :  { %291 = vperm.xlu1 %2648, %v2842_v9  }
  0x18   :  { %183 = vperm.xlu0 %2670, %v2853_v10  }
  0x19   :  { %2649 = vset.pattern.permute.xlu1 %v2741_v5 }
  0x1a   :  { %543 = vperm.xlu1 %2649, %v2833_v6  }
  0x1c   :  { %2673 = vset.pattern.permute.xlu0 %v2744_v11 }
  0x1d   :  { %415 = vperm.xlu0 %2673, %v2833_v6  }
  0x1e   :  { %2650 = vset.pattern.permute.xlu1 %v2744_v11 }
  0x1f   :  { %419 = vperm.xlu1 %2650, %v2842_v9  }
  0x21   :  { %427 = vperm.xlu0 %2673, %v2811_v0  }
  0x23   :  { %2651 = vset.pattern.permute.xlu1 %v2739_v2 }
  0x24   :  { %671 = vperm.xlu1 %2651, %v2833_v6  }
  0x25   :  { %439 = vperm.xlu0 %2673, %v2853_v10  }
  0x28   :  { %2652 = vset.pattern.permute.xlu1 %v2741_v5 }
  0x29   :  { %547 = vperm.xlu1 %2652, %v2842_v9   ;;  %2680 = vset.pattern.permute.xlu0 %v2742_v7 }
  0x2a   :  { %295 = vperm.xlu0 %2680, %v2816_v1  }
  0x2d   :  { %2653 = vset.pattern.permute.xlu1 %v2745_v12 }
  0x2e   :  { %799 = vperm.xlu1 %2653, %v2833_v6   ;;  %303 = vperm.xlu0 %2680, %v2825_v4  }
  0x32   :  { %2654 = vset.pattern.permute.xlu1 %v2744_v11  ;;  %315 = vperm.xlu0 %2680, %v2876_v13  }
  0x33   :  { %423 = vperm.xlu1 %2654, %v2816_v1  }
  0x36   :  { %2683 = vset.pattern.permute.xlu0 %v2746_v14 }
  0x37   :  { %2655 = vset.pattern.permute.xlu1 %v2739_v2  ;;  %927 = vperm.xlu0 %2683, %v2833_v6  }
  0x38   :  { %675 = vperm.xlu1 %2655, %v2842_v9  }
  0x3b   :  { %939 = vperm.xlu0 %2683, %v2811_v0  }
  0x3c   :  { %2656 = vset.pattern.permute.xlu1 %v2742_v7 }
  0x3d   :  { %299 = vperm.xlu1 %2656, %v2811_v0  }
  0x3f   :  { %947 = vperm.xlu0 %2683, %v2890_v15  }
  0x41   :  { %2657 = vset.pattern.permute.xlu1 %v2741_v5 }
  0x42   :  { %551 = vperm.xlu1 %2657, %v2816_v1  }
  0x43   :  { %2688 = vset.pattern.permute.xlu0 %v2745_v12 }
  0x44   :  { %803 = vperm.xlu0 %2688, %v2842_v9  }
  0x46   :  { %2658 = vset.pattern.permute.xlu1 %v2747_v16 }
  0x47   :  { %1055 = vperm.xlu1 %2658, %v2833_v6  }
  0x48   :  { %815 = vperm.xlu0 %2688, %v2825_v4  }
  0x4b   :  { %2659 = vset.pattern.permute.xlu1 %v2743_v8 }
  0x4c   :  { %175 = vperm.xlu1 %2659, %v2825_v4   ;;  %827 = vperm.xlu0 %2688, %v2876_v13  }
  0x50   :  { %2660 = vset.pattern.permute.xlu1 %v2739_v2  ;;  %2693 = vset.pattern.permute.xlu0 %v2747_v16 }
  0x51   :  { %679 = vperm.xlu1 %2660, %v2816_v1   ;;  %1059 = vperm.xlu0 %2693, %v2842_v9  }
  0x55   :  { %2661 = vset.pattern.permute.xlu1 %v2746_v14  ;;  %1071 = vperm.xlu0 %2693, %v2825_v4  }
  0x56   :  { %931 = vperm.xlu1 %2661, %v2842_v9  }
  0x59   :  { %1075 = vperm.xlu0 %2693, %v2890_v15  }
  0x5a   :  { %2662 = vset.pattern.permute.xlu1 %v2741_v5 }
  0x5b   :  { %555 = vperm.xlu1 %2662, %v2811_v0  }
  0x5d   :  { %1083 = vperm.xlu0 %2693, %v2876_v13  }
  0x5f   :  { %2663 = vset.pattern.permute.xlu1 %v2745_v12 }
  0x60   :  { %807 = vperm.xlu1 %2663, %v2816_v1  }
  0x61   :  { %2696 = vset.pattern.permute.xlu0 %v2740_v3 }
  0x62   :  { %95 = vperm.xlu0 %2696, %v2833_v6  }
  0x64   :  { %2664 = vset.pattern.permute.xlu1 %v2743_v8 }
  0x65   :  { %179 = vperm.xlu1 %2664, %v2890_v15  }
  0x66   :  { %99 = vperm.xlu0 %2696, %v2842_v9  }
  0x69   :  { %2665 = vset.pattern.permute.xlu1 %v2744_v11 }
  0x6a   :  { %431 = vperm.xlu1 %2665, %v2825_v4  }
  0x6e   :  { %2667 = vset.pattern.permute.xlu1 %v2746_v14 }
  0x6f   :  { %935 = vperm.xlu1 %2667, %v2816_v1  }
  0x73   :  { %2668 = vset.pattern.permute.xlu1 %v2742_v7 }
  0x74   :  { %307 = vperm.xlu1 %2668, %v2890_v15  }
  0x78   :  { %2671 = vset.pattern.permute.xlu1 %v2745_v12 }
  0x79   :  { %811 = vperm.xlu1 %2671, %v2811_v0  }
  0x7d   :  { %2672 = vset.pattern.permute.xlu1 %v2747_v16 }
  0x7e   :  { %1063 = vperm.xlu1 %2672, %v2816_v1  }
  0x81   :  { %v2932_v17 = vpop.permute.xlu1 %103  ;;  %v2934_v18 = vpop.permute.xlu0 %683 }
  0x82   :  { %4799 = vst [vmem:[#allocation5_spill] sm:$0xff] %v2932_v17  ;;  %2674 = vset.pattern.permute.xlu1 %v2744_v11 }
  0x83   :  { %435 = vperm.xlu1 %2674, %v2890_v15  }
  0x85   :  { %v2938_v19 = vpop.permute.xlu1 %107 }
  0x86   :  { %4800 = vst [vmem:[#allocation6_spill] sm:$0xff] %v2938_v19  ;;  %v2940_v20 = vpop.permute.xlu0 %559 }
  0x87   :  { %2675 = vset.pattern.permute.xlu1 %v2739_v2 }
  0x88   :  { %687 = vperm.xlu1 %2675, %v2825_v4  }
  0x8a   :  { %v2944_v21 = vpop.permute.xlu1 %287 }
  0x8b   :  { %v2946_v22 = vpop.permute.xlu0 %159  ;;  %v318_v28 = vmul.f32 %v2944_v21, %v2965_v27  ;;  %v1515_v31 = vmul.f32 %v2944_v21, %v2951_v23 }
  0x8c   :  { %2676 = vset.pattern.permute.xlu1 %v2742_v7  ;;  %v1419_v24 = vmul.f32 %v2946_v22, %v2951_v23 }
  0x8d   :  { %311 = vperm.xlu1 %2676, %v2853_v10  }
  0x8e   :  { %1451 = vrot.lane.b32.xlu0 %v1419_v24, %s2748_s23  ;;  %v3093_v24 = vsub.s32 0, %v1188_v62 }
  0x8f   :  { %v2958_v25 = vpop.permute.xlu1 %163  ;;  %v2960_v26 = vpop.permute.xlu0 %167 }
  0x90   :  { %v192_v33 = vmul.f32 %v2958_v25, %v2965_v27  ;;  %v1421_v39 = vmul.f32 %v2958_v25, %v2951_v23  ;;  %v1423_v1 = vmul.f32 %v2960_v26, %v2951_v23 }
  0x91   :  { %2677 = vset.pattern.permute.xlu1 %v2741_v5 }
  0x92   :  { %563 = vperm.xlu1 %2677, %v2890_v15   ;;  %350 = vrot.lane.b32.xlu0 %v318_v28, %s2749_s26 }
  0x93   :  { %v2972_v29 = vpop.permute.xlu0 %171 }
  0x94   :  { %v2974_v30 = vpop.permute.xlu1 %291 }
  0x95   :  { %v320_v44 = vmul.f32 %v2974_v30, %v2965_v27  ;;  %v1517_v49 = vmul.f32 %v2974_v30, %v2951_v23 }
  0x96   :  { %2678 = vset.pattern.permute.xlu1 %v2747_v16  ;;  %1547 = vrot.lane.b32.xlu0 %v1515_v31, %s2749_s26 }
  0x97   :  { %1067 = vperm.xlu1 %2678, %v2811_v0   ;;  %v2981_v32 = vpop.permute.xlu0 %183 }
  0x99   :  { %v2985_v34 = vpop.permute.xlu1 %543 }
  0x9a   :  { %226 = vrot.lane.b32.xlu0 %v192_v33, %s2748_s23  ;;  %v574_v47 = vmul.f32 %v2985_v34, %v2965_v27  ;;  %v1707_v52 = vmul.f32 %v2985_v34, %v2951_v23 }
  0x9b   :  { %2679 = vset.pattern.permute.xlu1 %v2743_v8 }
  0x9c   :  { %v2989_v35 = vpop.permute.xlu0 %415  ;;  %187 = vperm.xlu1 %2679, %v2876_v13  }
  0x9d   :  { %v446_v36 = vmul.f32 %v2989_v35, %v2965_v27  ;;  %v1611_v41 = vmul.f32 %v2989_v35, %v2951_v23 }
  0x9e   :  { %v2994_v37 = vpop.permute.xlu1 %419 }
  0x9f   :  { %478 = vrot.lane.b32.xlu0 %v446_v36, %s2750_s27  ;;  %v448_v59 = vmul.f32 %v2994_v37, %v2965_v27  ;;  %v1613_v8 = vmul.f32 %v2994_v37, %v2951_v23  ;;  %v3110_v36 = vld [vmem:[%s4761_s0 + $0x8] sm:$0xff] }
  0xa0   :  { %2681 = vset.pattern.permute.xlu1 %v2739_v2  ;;  %v2998_v38 = vpop.permute.xlu0 %427  ;;  %v195_v17 = vmul.f32 %v2960_v26, %v3110_v36 }
  0xa1   :  { %691 = vperm.xlu1 %2681, %v2890_v15  }
  0xa3   :  { %v3003_v40 = vpop.permute.xlu1 %671  ;;  %1455 = vrot.lane.b32.xlu0 %v1421_v39, %s2748_s23 }
  0xa4   :  { %v3008_v42 = vpop.permute.xlu0 %439  ;;  %v702_v0 = vmul.f32 %v3003_v40, %v2965_v27 }
  0xa5   :  { %2682 = vset.pattern.permute.xlu1 %v2746_v14 }
  0xa6   :  { %943 = vperm.xlu1 %2682, %v2825_v4  }
  0xa7   :  { %1643 = vrot.lane.b32.xlu0 %v1611_v41, %s2750_s27 }
  0xa8   :  { %v3013_v43 = vpop.permute.xlu1 %547 }
  0xa9   :  { %v3017_v45 = vpop.permute.xlu0 %295 }
  0xaa   :  { %2684 = vset.pattern.permute.xlu1 %v2741_v5  ;;  %v323_v39 = vmul.f32 %v3017_v45, %v3110_v36  ;;  %v1520_v57 = vmul.f32 %v3017_v45, %v3140_v55 }
  0xab   :  { %567 = vperm.xlu1 %2684, %v2853_v10   ;;  %354 = vrot.lane.b32.xlu0 %v320_v44, %s2749_s26 }
  0xad   :  { %v3022_v46 = vpop.permute.xlu1 %799  ;;  %v3026_v48 = vpop.permute.xlu0 %303 }
  0xaf   :  { %2685 = vset.pattern.permute.xlu1 %v2745_v12  ;;  %606 = vrot.lane.b32.xlu0 %v574_v47, %s2751_s28  ;;  %v577_v47 = vmul.f32 %v3013_v43, %v3110_v36 }
  0xb0   :  { %819 = vperm.xlu1 %2685, %v2890_v15  }
  0xb1   :  { %v3035_v51 = vpop.permute.xlu0 %315 }
  0xb2   :  { %v3033_v50 = vpop.permute.xlu1 %423  ;;  %4801 = vst [vmem:[#allocation7_spill] sm:$0xff] %v3035_v51 }
  0xb3   :  { %1551 = vrot.lane.b32.xlu0 %v1517_v49, %s2749_s26 }
  0xb4   :  { %2686 = vset.pattern.permute.xlu1 %v2744_v11 }
  0xb5   :  { %443 = vperm.xlu1 %2686, %v2876_v13  }
  0xb6   :  { %v3045_v54 = vpop.permute.xlu0 %927 }
  0xb7   :  { %v3042_v53 = vpop.permute.xlu1 %675  ;;  %1739 = vrot.lane.b32.xlu0 %v1707_v52, %s2751_s28 }
  0xb9   :  { %2687 = vset.pattern.permute.xlu1 %v2739_v2 }
  0xba   :  { %695 = vperm.xlu1 %2687, %v2853_v10   ;;  %v3055_v60 = vpop.permute.xlu0 %939 }
  0xbb   :  { %111 = vperm.xlu0 %2696, %v2825_v4   ;;  %v3067_v4 = vsub.s32 %v1186_v61, %v1188_v62  ;;  %v1710_v62 = vmul.f32 %v3013_v43, %v3140_v55 }
  0xbc   :  { %v3050_v58 = vpop.permute.xlu1 %299 }
  0xbd   :  { %4802 = vst [vmem:[#allocation8_spill] sm:$0xff] %v3067_v4 }
  0xbe   :  { %2689 = vset.pattern.permute.xlu1 %v2741_v5  ;;  %v3073_v5 = vld.sshfl [vmem:[%s4763_s2] sm:$0xff pattern:$0x75316420]  ;;  %v3075_v6 = vpop.permute.xlu0 %947 }
  0xbf   :  { %571 = vperm.xlu1 %2689, %v2876_v13   ;;  %482 = vrot.lane.b32.xlu0 %v448_v59, %s2750_s27  ;;  %4803 = vst [vmem:[#allocation9_spill] sm:$0xff] %v3075_v6 }
  0xc1   :  { %v3059_v63 = vpop.permute.xlu1 %551 }
  0xc3   :  { %2690 = vset.pattern.permute.xlu1 %v2745_v12  ;;  %734 = vrot.lane.b32.xlu0 %v702_v0, %s2753_s29  ;;  %v3084_v9 = vpop.permute.xlu0 %803  ;;  %v3091_v12 = vrot.slane %v3073_v5, %v3067_v4  ;;  %v319_v0 = vmul.f32 %v2944_v21, %v3110_v36 }
  0xc4   :  { %823 = vperm.xlu1 %2690, %v2853_v10  }
  0xc5   :  { %v1235_v28 = vrot.slane %v3091_v12, %v3093_v24 }
  0xc6   :  { %v3077_v7 = vpop.permute.xlu1 %1055 }
  0xc7   :  { %1459 = vrot.lane.b32.xlu0 %v1423_v1, %s2748_s23  ;;  %v3104_v33 = vpop.permute.xlu0 %815 }
  0xc8   :  { %2691 = vset.pattern.permute.xlu1 %v2739_v2  ;;  %v1803_v2 = vmul.f32 %v3003_v40, %v2951_v23 }
  0xc9   :  { %699 = vperm.xlu1 %2691, %v2876_v13  }
  0xcb   :  { %v3086_v11 = vpop.permute.xlu1 %175  ;;  %1647 = vrot.lane.b32.xlu0 %v1613_v8, %s2750_s27  ;;  %v3117_v44 = vpop.permute.xlu0 %827  ;;  %v1900_v8 = vmul.f32 %v3022_v46, %v3140_v55 }
  0xcc   :  { %4804 = vst [vmem:[#allocation10_spill] sm:$0xff] %v3117_v44 }
  0xcd   :  { %2692 = vset.pattern.permute.xlu1 %v2746_v14 }
  0xce   :  { %951 = vperm.xlu1 %2692, %v2853_v10  }
  0xcf   :  { %1835 = vrot.lane.b32.xlu0 %v1803_v2, %s2753_s29  ;;  %v1516_v2 = vmul.f32 %v2944_v21, %v3140_v55  ;;  %v447_v21 = vmul.f32 %v2989_v35, %v3110_v36 }
  0xd0   :  { %v3102_v31 = vpop.permute.xlu1 %679  ;;  %v3130_v52 = vpop.permute.xlu0 %1059 }
  0xd2   :  { %2694 = vset.pattern.permute.xlu1 %v2747_v16  ;;  %v190_v16 = vmul.f32 %v2946_v22, %v2965_v27 }
  0xd3   :  { %1079 = vperm.xlu1 %2694, %v2853_v10   ;;  %1265 = vperm.xlu0 %2696, %v1235_v28   ;;  %v196_v28 = vmul.f32 %v2972_v29, %v2965_v27 }
  0xd4   :  { %v3150_v59 = vpop.permute.xlu0 %1071 }
  0xd5   :  { %v3115_v41 = vpop.permute.xlu1 %931  ;;  %4805 = vst [vmem:[#allocation11_spill] sm:$0xff] %v3150_v59  ;;  %v1087_v59 = vmul.f32 %v3077_v7, %v3110_v36 }
  0xd7   :  { %2695 = vset.pattern.permute.xlu1 %v2746_v14  ;;  %360 = vrot.lane.b32.xlu0 %v323_v39, %s2749_s26  ;;  %v831_v14 = vmul.f32 %v3022_v46, %v3110_v36 }
  0xd8   :  { %955 = vperm.xlu1 %2695, %v2876_v13   ;;  %v191_v13 = vmul.f32 %v2946_v22, %v3110_v36  ;;  %v3162_v1 = vpop.permute.xlu0 %1075 }
  0xd9   :  { %4806 = vst [vmem:[#allocation12_spill] sm:$0xff] %v3162_v1  ;;  %v833_v1 = vmul.f32 %v3084_v9, %v3110_v36 }
  0xda   :  { %v3126_v49 = vpop.permute.xlu1 %555 }
  0xdb   :  { %612 = vrot.lane.b32.xlu0 %v577_v47, %s2751_s28 }
  0xdc   :  { %222 = vrot.lane.b32.xlu1 %v190_v16, %s2748_s23  ;;  %v193_v16 = vmul.f32 %v2958_v25, %v3110_v36  ;;  %v3178_v47 = vpop.permute.xlu0 %1083 }
  0xdd   :  { %2697 = vset.pattern.permute.xlu1 %v2740_v3  ;;  %v1420_v3 = vmul.f32 %v2946_v22, %v3140_v55  ;;  %4807 = vst [vmem:[#allocation13_spill] sm:$0xff] %v3178_v47  ;;  %v1995_v47 = vmul.f32 %v3045_v54, %v2951_v23 }
  0xdf   :  { %v3142_v56 = vpop.permute.xlu1 %807  ;;  %864 = vrot.lane.b32.xlu0 %v831_v14, %s2754_s14  ;;  %v450_v14 = vmul.f32 %v3033_v50, %v2965_v27 }
  0xe0   :  { %224 = vrot.lane.b32.xlu1 %v191_v13, %s2748_s23 }
  0xe3   :  { %1557 = vrot.lane.b32.xlu0 %v1520_v57, %s2749_s26  ;;  %v3190_v57 = vpop.permute.xlu0 %95 }
  0xe4   :  { %v3153_v61 = vpop.permute.xlu1 %179  ;;  %1453 = vrot.lane.b32.xlu1 %v1420_v3, %s2748_s23  ;;  %v704_v3 = vmul.f32 %v3042_v53, %v2965_v27 }
  0xe7   :  { %1745 = vrot.lane.b32.xlu0 %v1710_v62, %s2751_s28  ;;  %v1422_v62 = vmul.f32 %v2958_v25, %v3140_v55 }
  0xe8   :  { %352 = vrot.lane.b32.xlu1 %v319_v0, %s2749_s26  ;;  %v958_v0 = vmul.f32 %v3045_v54, %v2965_v27 }
  0xe9   :  { %v3164_v22 = vpop.permute.xlu1 %431 }
  0xeb   :  { %1933 = vrot.lane.b32.xlu0 %v1900_v8, %s2754_s14 }
  0xec   :  { %1549 = vrot.lane.b32.xlu1 %v1516_v2, %s2749_s26  ;;  %v3202_v2 = vpop.permute.xlu0 %99 }
  0xed   :  { %4808 = vst [vmem:[#allocation14_spill] sm:$0xff] %v3202_v2  ;;  %v1902_v2 = vmul.f32 %v3084_v9, %v3140_v55 }
  0xee   :  { %v3174_v39 = vpop.permute.xlu1 %935 }
  0xef   :  { %234 = vrot.lane.b32.xlu0 %v196_v28, %s2748_s23  ;;  %v1612_v28 = vmul.f32 %v2989_v35, %v3140_v55  ;;  %v1615_v35 = vmul.f32 %v3033_v50, %v2951_v23 }
  0xf0   :  { %228 = vrot.lane.b32.xlu1 %v193_v16, %s2748_s23  ;;  %v1425_v16 = vmul.f32 %v2972_v29, %v2951_v23 }
  0xf3   :  { %v3186_v13 = vpop.permute.xlu1 %307  ;;  %486 = vrot.lane.b32.xlu0 %v450_v14, %s2750_s27 }
  0xf4   :  { %480 = vrot.lane.b32.xlu1 %v447_v21, %s2750_s27  ;;  %v321_v21 = vmul.f32 %v2974_v30, %v3110_v36 }
  0xf7   :  { %738 = vrot.lane.b32.xlu0 %v704_v3, %s2753_s29 }
  0xf8   :  { %v3199_v8 = vpop.permute.xlu1 %811  ;;  %1457 = vrot.lane.b32.xlu1 %v1422_v62, %s2748_s23  ;;  %v575_v62 = vmul.f32 %v2985_v34, %v3110_v36 }
  0xfb   :  { %990 = vrot.lane.b32.xlu0 %v958_v0, %s2755_s15  ;;  %v1198_v0 = vcombine.high %v3073_v5, %v3073_v5 }
  0xfc   :  { %1645 = vrot.lane.b32.xlu1 %v1612_v28, %s2750_s27 }
  0xfd   :  { %v3208_v25 = vpop.permute.xlu1 %1063  ;;  %v3240_v5 = vrot.slane %v1198_v0, %v3067_v4  ;;  %v194_v0 = vmul.f32 %v2960_v26, %v2965_v27 }
  0xff   :  { %1463 = vrot.lane.b32.xlu0 %v1425_v16, %s2748_s23  ;;  %v1805_v16 = vmul.f32 %v3042_v53, %v2951_v23 }
 0x100   :  { %v3215_v14 = vpop.permute.xlu0 %1451  ;;  %356 = vrot.lane.b32.xlu1 %v321_v21, %s2749_s26  ;;  %v1518_v21 = vmul.f32 %v2974_v30, %v3140_v55  ;;  %v1239_v30 = vrot.slane %v3240_v5, %v3093_v24 }
 0x102   :  { %v3220_v3 = vpop.permute.xlu1 %435 }
 0x103   :  { %1651 = vrot.lane.b32.xlu0 %v1615_v35, %s2750_s27 }
 0x104   :  { %v3227_v28 = vpop.permute.xlu0 %350  ;;  %608 = vrot.lane.b32.xlu1 %v575_v62, %s2751_s28  ;;  %v1708_v62 = vmul.f32 %v2985_v34, %v3140_v55  ;;  %v325_v34 = vmul.f32 %v3050_v58, %v3110_v36 }
 0x107   :  { %v3234_v19 = vpop.permute.xlu1 %687  ;;  %1839 = vrot.lane.b32.xlu0 %v1805_v16, %s2753_s29 }
 0x108   :  { %v3242_v35 = vpop.permute.xlu0 %1547  ;;  %1553 = vrot.lane.b32.xlu1 %v1518_v21, %s2749_s26 }
 0x10b   :  { %2027 = vrot.lane.b32.xlu0 %v1995_v47, %s2755_s15 }
 0x10c   :  { %v3250_v44 = vpop.permute.xlu1 %311  ;;  %v3252_v16 = vpop.permute.xlu0 %226  ;;  %1741 = vrot.lane.b32.xlu1 %v1708_v62, %s2751_s28  ;;  %v579_v62 = vmul.f32 %v3059_v63, %v3110_v36 }
 0x10d   :  { %4809 = vst [vmem:[#allocation15_spill] sm:$0xff] %v3252_v16  ;;  %v1424_v16 = vmul.f32 %v2960_v26, %v3140_v55 }
 0x10f   :  { %1269 = vperm.xlu0 %2696, %v1239_v30  }
 0x110   :  { %230 = vrot.lane.b32.xlu1 %v194_v0, %s2748_s23  ;;  %v449_v0 = vmul.f32 %v2994_v37, %v3110_v36 }
 0x111   :  { %v3258_v21 = vpop.permute.xlu1 %563  ;;  %v3262_v47 = vpop.permute.xlu0 %478 }
 0x113   :  { %364 = vrot.lane.b32.xlu0 %v325_v34, %s2749_s26 }
 0x114   :  { %232 = vrot.lane.b32.xlu1 %v195_v17, %s2748_s23  ;;  %v703_v17 = vmul.f32 %v3003_v40, %v3110_v36 }
 0x115   :  { %v3277_v6 = vpop.permute.xlu0 %1455 }
 0x116   :  { %v3270_v30 = vpop.permute.xlu1 %1067  ;;  %4810 = vst [vmem:[#allocation16_spill] sm:$0xff] %v3277_v6 }
 0x117   :  { %616 = vrot.lane.b32.xlu0 %v579_v62, %s2751_s28 }
 0x118   :  { %484 = vrot.lane.b32.xlu1 %v449_v0, %s2750_s27 }
 0x119   :  { %v3288_v62 = vpop.permute.xlu0 %1643 }
 0x11b   :  { %v3282_v34 = vpop.permute.xlu1 %187  ;;  %868 = vrot.lane.b32.xlu0 %v833_v1, %s2754_s14  ;;  %v1522_v1 = vmul.f32 %v3050_v58, %v3140_v55 }
 0x11c   :  { %736 = vrot.lane.b32.xlu1 %v703_v17, %s2753_s29  ;;  %v1614_v17 = vmul.f32 %v2994_v37, %v3140_v55 }
 0x11d   :  { %v3301_v6 = vpop.permute.xlu0 %354 }
 0x11e   :  { %4811 = vst [vmem:[#allocation17_spill] sm:$0xff] %v3301_v6 }
 0x11f   :  { %1120 = vrot.lane.b32.xlu0 %v1087_v59, %s2756_s16  ;;  %v1712_v59 = vmul.f32 %v3059_v63, %v3140_v55 }
 0x120   :  { %v3293_v0 = vpop.permute.xlu1 %691  ;;  %1461 = vrot.lane.b32.xlu1 %v1424_v16, %s2748_s23  ;;  %v1804_v16 = vmul.f32 %v3003_v40, %v3140_v55  ;;  %v2092_v40 = vmul.f32 %v3077_v7, %v3140_v55 }
 0x121   :  { %v3314_v37 = vpop.permute.xlu0 %606 }
 0x123   :  { %1561 = vrot.lane.b32.xlu0 %v1522_v1, %s2749_s26 }
 0x124   :  { %1649 = vrot.lane.b32.xlu1 %v1614_v17, %s2750_s27  ;;  %v322_v17 = vmul.f32 %v3017_v45, %v2965_v27 }
 0x125   :  { %v3304_v26 = vpop.permute.xlu1 %943 }
 0x126   :  { %4812 = vst [vmem:[#allocation18_spill] sm:$0xff] %v3304_v26  ;;  %v4793_v26 = vmov 0.0|0.0  }
 0x127   :  { %1749 = vrot.lane.b32.xlu0 %v1712_v59, %s2751_s28  ;;  %v576_v59 = vmul.f32 %v3013_v43, %v2965_v27  ;;  %2561 = vmatprep.subr.bf16.mxu0 %v4793_v26 }
 0x128   :  { %1837 = vrot.lane.b32.xlu1 %v1804_v16, %s2753_s29  ;;  %v3329_v16 = vpop.permute.xlu0 %1551  ;;  %2585 = vmatprep.subr.bf16.mxu1 %v4793_v26 }
 0x129   :  { %4815 = vst [vmem:[#allocation21_spill] sm:$0xff] %v3329_v16 }
 0x12a   :  { %v3316_v1 = vpop.permute.xlu1 %567 }
 0x12b   :  { %4813 = vst [vmem:[#allocation19_spill] sm:$0xff] %v3316_v1  ;;  %1937 = vrot.lane.b32.xlu0 %v1902_v2, %s2754_s14  ;;  %v198_v1 = vmul.f32 %v3086_v11, %v2965_v27  ;;  %v830_v2 = vmul.f32 %v3022_v46, %v2965_v27 }
 0x12c   :  { %358 = vrot.lane.b32.xlu1 %v322_v17, %s2749_s26 }
 0x12f   :  { %v3326_v6 = vpop.permute.xlu1 %819  ;;  %2125 = vrot.lane.b32.xlu0 %v2092_v40, %s2756_s16  ;;  %v3342_v40 = vpop.permute.xlu0 %1739 }
 0x130   :  { %4814 = vst [vmem:[#allocation20_spill] sm:$0xff] %v3326_v6  ;;  %610 = vrot.lane.b32.xlu1 %v576_v59, %s2751_s28  ;;  %v452_v6 = vmul.f32 %v2998_v38, %v2965_v27  ;;  %v1519_v59 = vmul.f32 %v3017_v45, %v2951_v23  ;;  %v960_v45 = vmul.f32 %v3115_v41, %v2965_v27 }
 0x133   :  { %238 = vrot.lane.b32.xlu0 %v198_v1, %s2748_s23  ;;  %v706_v1 = vmul.f32 %v3102_v31, %v2965_v27 }
 0x134   :  { %v3337_v17 = vpop.permute.xlu1 %443  ;;  %862 = vrot.lane.b32.xlu1 %v830_v2, %s2754_s14  ;;  %v1709_v2 = vmul.f32 %v3013_v43, %v2951_v23  ;;  %v1427_v43 = vmul.f32 %v3086_v11, %v2951_v23 }
 0x135   :  { %4816 = vst [vmem:[#allocation22_spill] sm:$0xff] %v3337_v17 }
 0x137   :  { %490 = vrot.lane.b32.xlu0 %v452_v6, %s2750_s27 }
 0x138   :  { %1555 = vrot.lane.b32.xlu1 %v1519_v59, %s2749_s26 }
 0x139   :  { %v3348_v16 = vpop.permute.xlu1 %695 }
 0x13a   :  { %4817 = vst [vmem:[#allocation23_spill] sm:$0xff] %v3348_v16  ;;  %v3352_v17 = vpop.permute.xlu0 %111  ;;  %v1899_v16 = vmul.f32 %v3022_v46, %v2951_v23  ;;  %v197_v46 = vmul.f32 %v2972_v29, %v3110_v36 }
 0x13b   :  { %4818 = vst [vmem:[#allocation24_spill] sm:$0xff] %v3352_v17  ;;  %742 = vrot.lane.b32.xlu0 %v706_v1, %s2753_s29  ;;  %v1617_v17 = vmul.f32 %v2998_v38, %v2951_v23 }
 0x13c   :  { %1743 = vrot.lane.b32.xlu1 %v1709_v2, %s2751_s28 }
 0x13e   :  { %v3360_v6 = vpop.permute.xlu1 %571  ;;  %v3362_v59 = vpop.permute.xlu0 %482 }
 0x13f   :  { %4819 = vst [vmem:[#allocation25_spill] sm:$0xff] %v3360_v6  ;;  %4820 = vst [vmem:[#allocation26_spill] sm:$0xff] %v3362_v59  ;;  %994 = vrot.lane.b32.xlu0 %v960_v45, %s2755_s15  ;;  %v1807_v45 = vmul.f32 %v3102_v31, %v2951_v23 }
 0x140   :  { %1931 = vrot.lane.b32.xlu1 %v1899_v16, %s2754_s14 }
 0x142   :  { %v3370_v1 = vpop.permute.xlu0 %734 }
 0x143   :  { %v3372_v2 = vpop.permute.xlu1 %823  ;;  %1467 = vrot.lane.b32.xlu0 %v1427_v43, %s2748_s23 }
 0x144   :  { %4821 = vst [vmem:[#allocation27_spill] sm:$0xff] %v3372_v2  ;;  %115 = vperm.xlu1 %2697, %v2890_v15   ;;  %v451_v15 = vmul.f32 %v3033_v50, %v3110_v36  ;;  %v705_v2 = vmul.f32 %v3042_v53, %v3110_v36 }
 0x146   :  { %v3378_v6 = vpop.permute.xlu0 %1459 }
 0x147   :  { %4822 = vst [vmem:[#allocation28_spill] sm:$0xff] %v3378_v6  ;;  %1655 = vrot.lane.b32.xlu0 %v1617_v17, %s2750_s27  ;;  %v1228_v6 = vcombine.high %v3091_v12, %v3091_v12 }
 0x148   :  { %v3383_v16 = vpop.permute.xlu1 %699  ;;  %236 = vrot.lane.b32.xlu1 %v197_v46, %s2748_s23  ;;  %v1997_v46 = vmul.f32 %v3115_v41, %v2951_v23 }
 0x149   :  { %4823 = vst [vmem:[#allocation29_spill] sm:$0xff] %v3383_v16 }
 0x14a   :  { %v3388_v43 = vpop.permute.xlu0 %1647 }
 0x14b   :  { %4824 = vst [vmem:[#allocation30_spill] sm:$0xff] %v3388_v43  ;;  %1843 = vrot.lane.b32.xlu0 %v1807_v45, %s2753_s29  ;;  %v1243_v43 = vrot.slane %v1228_v6, %v3093_v24  ;;  %v1426_v6 = vmul.f32 %v2972_v29, %v3140_v55  ;;  %v835_v29 = vmul.f32 %v3142_v56, %v3110_v36 }
 0x14c   :  { %488 = vrot.lane.b32.xlu1 %v451_v15, %s2750_s27  ;;  %v959_v15 = vmul.f32 %v3045_v54, %v3110_v36 }
 0x14d   :  { %v3396_v17 = vpop.permute.xlu1 %951 }
 0x14e   :  { %4825 = vst [vmem:[#allocation31_spill] sm:$0xff] %v3396_v17  ;;  %v3400_v16 = vpop.permute.xlu0 %1835  ;;  %v327_v17 = vmul.f32 %v3026_v48, %v3110_v36 }
 0x14f   :  { %2031 = vrot.lane.b32.xlu0 %v1997_v46, %s2755_s15 }
 0x150   :  { %740 = vrot.lane.b32.xlu1 %v705_v2, %s2753_s29  ;;  %v581_v2 = vmul.f32 %v3126_v49, %v3110_v36 }
 0x152   :  { %v3407_v12 = vpop.permute.xlu1 %1079  ;;  %v3409_v45 = vpop.permute.xlu0 %1265 }
 0x153   :  { %4826 = vst [vmem:[#allocation32_spill] sm:$0xff] %v3407_v12  ;;  %1273 = vperm.xlu0 %2696, %v1243_v43  }
 0x154   :  { %992 = vrot.lane.b32.xlu1 %v959_v15, %s2755_s15  ;;  %v1616_v15 = vmul.f32 %v3033_v50, %v3140_v55  ;;  %v1089_v50 = vmul.f32 %v3130_v52, %v3110_v36 }
 0x156   :  { %v3416_v59 = vpop.permute.xlu0 %360 }
 0x157   :  { %4827 = vst [vmem:[#allocation33_spill] sm:$0xff] %v3416_v59  ;;  %v3420_v46 = vpop.permute.xlu1 %955  ;;  %368 = vrot.lane.b32.xlu0 %v327_v17, %s2749_s26 }
 0x158   :  { %4828 = vst [vmem:[#allocation34_spill] sm:$0xff] %v3420_v46  ;;  %1465 = vrot.lane.b32.xlu1 %v1426_v6, %s2748_s23  ;;  %v1806_v6 = vmul.f32 %v3042_v53, %v3140_v55  ;;  %v1524_v53 = vmul.f32 %v3026_v48, %v3140_v55 }
 0x15a   :  { %v3426_v43 = vpop.permute.xlu0 %612 }
 0x15b   :  { %4829 = vst [vmem:[#allocation35_spill] sm:$0xff] %v3426_v43  ;;  %620 = vrot.lane.b32.xlu0 %v581_v2, %s2751_s28  ;;  %v3431_v12 = vpop.permute.xlu1 %222 }
 0x15c   :  { %1653 = vrot.lane.b32.xlu1 %v1616_v15, %s2750_s27  ;;  %v1996_v15 = vmul.f32 %v3045_v54, %v3140_v55  ;;  %v1714_v54 = vmul.f32 %v3126_v49, %v3140_v55 }
 0x15e   :  { %v3436_v17 = vpop.permute.xlu0 %864 }
 0x15f   :  { %872 = vrot.lane.b32.xlu0 %v835_v29, %s2754_s14  ;;  %v3441_v46 = vpop.permute.xlu1 %224 }
 0x160   :  { %1841 = vrot.lane.b32.xlu1 %v1806_v6, %s2753_s29  ;;  %v324_v6 = vmul.f32 %v3050_v58, %v2965_v27 }
 0x162   :  { %v3446_v2 = vpop.permute.xlu0 %1557 }
 0x163   :  { %4830 = vst [vmem:[#allocation36_spill] sm:$0xff] %v3446_v2  ;;  %1124 = vrot.lane.b32.xlu0 %v1089_v50, %s2756_s16  ;;  %v3451_v59 = vpop.permute.xlu1 %1453 }
 0x164   :  { %2029 = vrot.lane.b32.xlu1 %v1996_v15, %s2755_s15  ;;  %v578_v15 = vmul.f32 %v3059_v63, %v2965_v27 }
 0x166   :  { %v3456_v29 = vpop.permute.xlu0 %1745 }
 0x167   :  { %4831 = vst [vmem:[#allocation37_spill] sm:$0xff] %v3456_v29  ;;  %1565 = vrot.lane.b32.xlu0 %v1524_v53, %s2749_s26  ;;  %v3461_v2 = vpop.permute.xlu1 %352  ;;  %v1904_v53 = vmul.f32 %v3142_v56, %v3140_v55 }
 0x168   :  { %362 = vrot.lane.b32.xlu1 %v324_v6, %s2749_s26  ;;  %v832_v6 = vmul.f32 %v3084_v9, %v2965_v27 }
 0x16a   :  { %v3466_v50 = vpop.permute.xlu0 %1933 }
 0x16b   :  { %1753 = vrot.lane.b32.xlu0 %v1714_v54, %s2751_s28  ;;  %v3471_v29 = vpop.permute.xlu1 %1549  ;;  %v2094_v54 = vmul.f32 %v3130_v52, %v3140_v55 }
 0x16c   :  { %614 = vrot.lane.b32.xlu1 %v578_v15, %s2751_s28  ;;  %v1086_v15 = vmul.f32 %v3077_v7, %v2965_v27 }
 0x16e   :  { %v3476_v43 = vpop.permute.xlu0 %234 }
 0x16f   :  { %4832 = vst [vmem:[#allocation38_spill] sm:$0xff] %v3476_v43  ;;  %1941 = vrot.lane.b32.xlu0 %v1904_v53, %s2754_s14  ;;  %v3481_v51 = vpop.permute.xlu1 %228  ;;  %v200_v53 = vmul.f32 %v3153_v61, %v2965_v27 }
 0x170   :  { %4833 = vst [vmem:[#allocation39_spill] sm:$0xff] %v3481_v51  ;;  %866 = vrot.lane.b32.xlu1 %v832_v6, %s2754_s14  ;;  %v1521_v6 = vmul.f32 %v3050_v58, %v2951_v23 }
 0x172   :  { %v3486_v4 = vpop.permute.xlu0 %486 }
 0x173   :  { %4834 = vst [vmem:[#allocation40_spill] sm:$0xff] %v3486_v4  ;;  %2129 = vrot.lane.b32.xlu0 %v2094_v54, %s2756_s16  ;;  %v3491_v43 = vpop.permute.xlu1 %480  ;;  %v454_v54 = vmul.f32 %v3164_v22, %v2965_v27 }
 0x174   :  { %1118 = vrot.lane.b32.xlu1 %v1086_v15, %s2756_s16 }
 0x176   :  { %v3496_v51 = vpop.permute.xlu0 %738 }
 0x177   :  { %4835 = vst [vmem:[#allocation41_spill] sm:$0xff] %v3496_v51  ;;  %242 = vrot.lane.b32.xlu0 %v200_v53, %s2748_s23  ;;  %v3501_v4 = vpop.permute.xlu1 %1457  ;;  %v1711_v51 = vmul.f32 %v3059_v63, %v2951_v23  ;;  %v708_v53 = vmul.f32 %v2934_v18, %v2965_v27  ;;  %v962_v63 = vmul.f32 %v3174_v39, %v2965_v27 }
 0x178   :  { %4836 = vst [vmem:[#allocation42_spill] sm:$0xff] %v3501_v4  ;;  %1559 = vrot.lane.b32.xlu1 %v1521_v6, %s2749_s26  ;;  %v1901_v4 = vmul.f32 %v3084_v9, %v2951_v23  ;;  %v1429_v9 = vmul.f32 %v3153_v61, %v2951_v23 }
 0x17a   :  { %v3508_v15 = vpop.permute.xlu0 %990 }
 0x17b   :  { %494 = vrot.lane.b32.xlu0 %v454_v54, %s2750_s27  ;;  %v3513_v58 = vpop.permute.xlu1 %1645 }
 0x17c   :  { %1747 = vrot.lane.b32.xlu1 %v1711_v51, %s2751_s28  ;;  %v2091_v51 = vmul.f32 %v3077_v7, %v2951_v23  ;;  %v1619_v7 = vmul.f32 %v3164_v22, %v2951_v23 }
 0x17e   :  { %v3518_v6 = vpop.permute.xlu0 %1463 }
 0x17f   :  { %4837 = vst [vmem:[#allocation43_spill] sm:$0xff] %v3518_v6  ;;  %746 = vrot.lane.b32.xlu0 %v708_v53, %s2753_s29  ;;  %v3523_v26 = vpop.permute.xlu1 %356 }
 0x180   :  { %4838 = vst [vmem:[#allocation44_spill] sm:$0xff] %v3523_v26  ;;  %1935 = vrot.lane.b32.xlu1 %v1901_v4, %s2754_s14  ;;  %v1230_v26 = vcombine.high %v3240_v5, %v3240_v5  ;;  %v961_v5 = vmul.f32 %v3115_v41, %v3110_v36 }
 0x182   :  { %v3528_v54 = vpop.permute.xlu0 %1651 }
 0x183   :  { %4839 = vst [vmem:[#allocation45_spill] sm:$0xff] %v3528_v54  ;;  %998 = vrot.lane.b32.xlu0 %v962_v63, %s2755_s15  ;;  %v3533_v6 = vpop.permute.xlu1 %608  ;;  %v199_v63 = vmul.f32 %v3086_v11, %v3110_v36 }
 0x184   :  { %2123 = vrot.lane.b32.xlu1 %v2091_v51, %s2756_s16 }
 0x186   :  { %v3538_v53 = vpop.permute.xlu0 %1839 }
 0x187   :  { %4840 = vst [vmem:[#allocation46_spill] sm:$0xff] %v3538_v53  ;;  %1471 = vrot.lane.b32.xlu0 %v1429_v9, %s2748_s23  ;;  %v3541_v4 = vpop.permute.xlu1 %1553  ;;  %v1809_v9 = vmul.f32 %v2934_v18, %v2951_v23 }
 0x188   :  { %4841 = vst [vmem:[#allocation47_spill] sm:$0xff] %v3541_v4  ;;  %119 = vperm.xlu1 %2697, %v2853_v10   ;;  %v453_v10 = vmul.f32 %v2998_v38, %v3110_v36 }
 0x18a   :  { %v3546_v54 = vpop.permute.xlu0 %2027 }
 0x18b   :  { %4842 = vst [vmem:[#allocation48_spill] sm:$0xff] %v3546_v54  ;;  %1659 = vrot.lane.b32.xlu0 %v1619_v7, %s2750_s27  ;;  %v3551_v51 = vpop.permute.xlu1 %1741  ;;  %v1999_v7 = vmul.f32 %v3174_v39, %v2951_v23 }
 0x18c   :  { %240 = vrot.lane.b32.xlu1 %v199_v63, %s2748_s23 }
 0x18e   :  { %v3556_v53 = vpop.permute.xlu0 %1269 }
 0x18f   :  { %4843 = vst [vmem:[#allocation49_spill] sm:$0xff] %v3556_v53  ;;  %1847 = vrot.lane.b32.xlu0 %v1809_v9, %s2753_s29  ;;  %v3561_v4 = vpop.permute.xlu1 %230  ;;  %v707_v53 = vmul.f32 %v3102_v31, %v3110_v36  ;;  %v1247_v9 = vrot.slane %v1230_v26, %v3093_v24  ;;  %v1428_v26 = vmul.f32 %v3086_v11, %v3140_v55 }
 0x190   :  { %4844 = vst [vmem:[#allocation50_spill] sm:$0xff] %v3561_v4  ;;  %492 = vrot.lane.b32.xlu1 %v453_v10, %s2750_s27  ;;  %v837_v11 = vmul.f32 %v3199_v8, %v3110_v36 }
 0x192   :  { %v3568_v63 = vpop.permute.xlu0 %364 }
 0x193   :  { %4845 = vst [vmem:[#allocation51_spill] sm:$0xff] %v3568_v63  ;;  %2035 = vrot.lane.b32.xlu0 %v1999_v7, %s2755_s15  ;;  %v3573_v54 = vpop.permute.xlu1 %232  ;;  %v329_v63 = vmul.f32 %v3186_v13, %v3110_v36 }
 0x194   :  { %4846 = vst [vmem:[#allocation52_spill] sm:$0xff] %v3573_v54  ;;  %744 = vrot.lane.b32.xlu1 %v707_v53, %s2753_s29 }
 0x196   :  { %v3577_v4 = vpop.permute.xlu0 %616 }
 0x197   :  { %4847 = vst [vmem:[#allocation53_spill] sm:$0xff] %v3577_v4  ;;  %1277 = vperm.xlu0 %2696, %v1247_v9   ;;  %v3581_v10 = vpop.permute.xlu1 %484  ;;  %v583_v9 = vmul.f32 %v2940_v20, %v3110_v36 }
 0x198   :  { %996 = vrot.lane.b32.xlu1 %v961_v5, %s2755_s15  ;;  %v1618_v5 = vmul.f32 %v2998_v38, %v3140_v55  ;;  %v1091_v38 = vmul.f32 %v3208_v25, %v3110_v36 }
 0x19a   :  { %v3586_v7 = vpop.permute.xlu0 %868 }
 0x19b   :  { %4848 = vst [vmem:[#allocation54_spill] sm:$0xff] %v3586_v7  ;;  %372 = vrot.lane.b32.xlu0 %v329_v63, %s2749_s26  ;;  %v3591_v53 = vpop.permute.xlu1 %736 }
 0x19c   :  { %1469 = vrot.lane.b32.xlu1 %v1428_v26, %s2748_s23  ;;  %v1808_v26 = vmul.f32 %v3102_v31, %v3140_v55  ;;  %v1526_v31 = vmul.f32 %v3186_v13, %v3140_v55 }
 0x19e   :  { %v3596_v4 = vpop.permute.xlu0 %1120 }
 0x19f   :  { %624 = vrot.lane.b32.xlu0 %v583_v9, %s2751_s28  ;;  %v3601_v54 = vpop.permute.xlu1 %1461 }
 0x1a0   :  { %4849 = vst [vmem:[#allocation55_spill] sm:$0xff] %v3601_v54  ;;  %1657 = vrot.lane.b32.xlu1 %v1618_v5, %s2750_s27  ;;  %v1998_v5 = vmul.f32 %v3115_v41, %v3140_v55  ;;  %v1716_v41 = vmul.f32 %v2940_v20, %v3140_v55 }
 0x1a2   :  { %v3606_v63 = vpop.permute.xlu0 %1561 }
 0x1a3   :  { %4850 = vst [vmem:[#allocation56_spill] sm:$0xff] %v3606_v63  ;;  %876 = vrot.lane.b32.xlu0 %v837_v11, %s2754_s14  ;;  %v3611_v7 = vpop.permute.xlu1 %1649 }
 0x1a4   :  { %4851 = vst [vmem:[#allocation57_spill] sm:$0xff] %v3611_v7  ;;  %1845 = vrot.lane.b32.xlu1 %v1808_v26, %s2753_s29  ;;  %v326_v26 = vmul.f32 %v3026_v48, %v2965_v27 }
 0x1a6   :  { %v3616_v9 = vpop.permute.xlu0 %1749 }
 0x1a7   :  { %4852 = vst [vmem:[#allocation58_spill] sm:$0xff] %v3616_v9  ;;  %1128 = vrot.lane.b32.xlu0 %v1091_v38, %s2756_s16  ;;  %v3621_v63 = vpop.permute.xlu1 %1837 }
 0x1a8   :  { %2033 = vrot.lane.b32.xlu1 %v1998_v5, %s2755_s15  ;;  %v580_v5 = vmul.f32 %v3126_v49, %v2965_v27 }
 0x1aa   :  { %v3626_v11 = vpop.permute.xlu0 %1937 }
 0x1ab   :  { %4853 = vst [vmem:[#allocation59_spill] sm:$0xff] %v3626_v11  ;;  %1569 = vrot.lane.b32.xlu0 %v1526_v31, %s2749_s26  ;;  %v3631_v9 = vpop.permute.xlu1 %358  ;;  %v1906_v31 = vmul.f32 %v3199_v8, %v3140_v55 }
 0x1ac   :  { %4854 = vst [vmem:[#allocation60_spill] sm:$0xff] %v3631_v9  ;;  %366 = vrot.lane.b32.xlu1 %v326_v26, %s2749_s26  ;;  %v834_v26 = vmul.f32 %v3142_v56, %v2965_v27 }
 0x1ae   :  { %v3636_v38 = vpop.permute.xlu0 %2125 }
 0x1af   :  { %1757 = vrot.lane.b32.xlu0 %v1716_v41, %s2751_s28  ;;  %v3641_v54 = vpop.permute.xlu1 %610  ;;  %v2096_v41 = vmul.f32 %v3208_v25, %v3140_v55 }
 0x1b0   :  { %4855 = vst [vmem:[#allocation61_spill] sm:$0xff] %v3641_v54  ;;  %618 = vrot.lane.b32.xlu1 %v580_v5, %s2751_s28  ;;  %v1088_v5 = vmul.f32 %v3130_v52, %v2965_v27 }
 0x1b2   :  { %v3646_v9 = vpop.permute.xlu0 %238 }
 0x1b3   :  { %4856 = vst [vmem:[#allocation62_spill] sm:$0xff] %v3646_v9  ;;  %1945 = vrot.lane.b32.xlu0 %v1906_v31, %s2754_s14  ;;  %v3651_v11 = vpop.permute.xlu1 %862  ;;  %v203_v31 = vmul.f32 %v2981_v32, %v3110_v36 }
 0x1b4   :  { %870 = vrot.lane.b32.xlu1 %v834_v26, %s2754_s14  ;;  %v1523_v26 = vmul.f32 %v3026_v48, %v2951_v23  ;;  %v711_v48 = vmul.f32 %v3234_v19, %v3110_v36 }
 0x1b6   :  { %v3656_v7 = vpop.permute.xlu0 %490 }
 0x1b7   :  { %4857 = vst [vmem:[#allocation63_spill] sm:$0xff] %v3656_v7  ;;  %2133 = vrot.lane.b32.xlu0 %v2096_v41, %s2756_s16  ;;  %v3661_v9 = vpop.permute.xlu1 %1555  ;;  %v457_v41 = vmul.f32 %v3220_v3, %v3110_v36 }
 0x1b8   :  { %4858 = vst [vmem:[#allocation64_spill] sm:$0xff] %v3661_v9  ;;  %1122 = vrot.lane.b32.xlu1 %v1088_v5, %s2756_s16  ;;  %v1713_v5 = vmul.f32 %v3126_v49, %v2951_v23  ;;  %v965_v49 = vmul.f32 %v3055_v60, %v3110_v36 }
 0x1ba   :  { %v3666_v54 = vpop.permute.xlu0 %742 }
 0x1bb   :  { %4859 = vst [vmem:[#allocation65_spill] sm:$0xff] %v3666_v54  ;;  %248 = vrot.lane.b32.xlu0 %v203_v31, %s2748_s23  ;;  %v3671_v7 = vpop.permute.xlu1 %1743 }
 0x1bc   :  { %4860 = vst [vmem:[#allocation66_spill] sm:$0xff] %v3671_v7  ;;  %1563 = vrot.lane.b32.xlu1 %v1523_v26, %s2749_s26  ;;  %v1903_v26 = vmul.f32 %v3142_v56, %v2951_v23  ;;  %v1432_v56 = vmul.f32 %v2981_v32, %v3140_v55 }
 0x1be   :  { %v3676_v9 = vpop.permute.xlu0 %994 }
 0x1bf   :  { %4861 = vst [vmem:[#allocation67_spill] sm:$0xff] %v3676_v9  ;;  %500 = vrot.lane.b32.xlu0 %v457_v41, %s2750_s27  ;;  %v3681_v54 = vpop.permute.xlu1 %1931 }
 0x1c0   :  { %1751 = vrot.lane.b32.xlu1 %v1713_v5, %s2751_s28  ;;  %v2093_v5 = vmul.f32 %v3130_v52, %v2951_v23  ;;  %v1622_v23 = vmul.f32 %v3220_v3, %v3140_v55 }
 0x1c2   :  { %v3686_v31 = vpop.permute.xlu0 %1467 }
 0x1c3   :  { %4862 = vst [vmem:[#allocation68_spill] sm:$0xff] %v3686_v31  ;;  %752 = vrot.lane.b32.xlu0 %v711_v48, %s2753_s29  ;;  %v3691_v7 = vpop.permute.xlu1 %115 }
 0x1c4   :  { %4863 = vst [vmem:[#allocation69_spill] sm:$0xff] %v3691_v7  ;;  %1939 = vrot.lane.b32.xlu1 %v1903_v26, %s2754_s14 }
 0x1c6   :  { %v3696_v41 = vpop.permute.xlu0 %1655 }
 0x1c7   :  { %4864 = vst [vmem:[#allocation70_spill] sm:$0xff] %v3696_v41  ;;  %1004 = vrot.lane.b32.xlu0 %v965_v49, %s2755_s15  ;;  %v3701_v31 = vpop.permute.xlu1 %236  ;;  %v2705_v41 = vld [vmem:[%s4762_s1 + $0x7] ss:$0 sm:$0xff]  ;;  %v201_v49 = vmul.f32 %v3153_v61, %v3110_v36 }
 0x1c8   :  { %4865 = vst [vmem:[#allocation71_spill] sm:$0xff] %v3701_v31  ;;  %2127 = vrot.lane.b32.xlu1 %v2093_v5, %s2756_s16 }
 0x1ca   :  { %v3706_v48 = vpop.permute.xlu0 %1843 }
 0x1cb   :  { %4866 = vst [vmem:[#allocation72_spill] sm:$0xff] %v3706_v48  ;;  %1477 = vrot.lane.b32.xlu0 %v1432_v56, %s2748_s23  ;;  %v3709_v26 = vpop.permute.xlu1 %488  ;;  %v1812_v56 = vmul.f32 %v3234_v19, %v3140_v55 }
 0x1cc   :  { %4867 = vst [vmem:[#allocation73_spill] sm:$0xff] %v3709_v26  ;;  %123 = vperm.xlu1 %2697, %v2705_v41   ;;  %v455_v41 = vmul.f32 %v3164_v22, %v3110_v36 }
 0x1ce   :  { %v3716_v52 = vpop.permute.xlu0 %2031 }
 0x1cf   :  { %4868 = vst [vmem:[#allocation74_spill] sm:$0xff] %v3716_v52  ;;  %1665 = vrot.lane.b32.xlu0 %v1622_v23, %s2750_s27  ;;  %v3721_v5 = vpop.permute.xlu1 %740  ;;  %v2002_v23 = vmul.f32 %v3055_v60, %v3140_v55 }
 0x1d0   :  { %244 = vrot.lane.b32.xlu1 %v201_v49, %s2748_s23  ;;  %v709_v49 = vmul.f32 %v2934_v18, %v3110_v36 }
 0x1d2   :  { %v3726_v31 = vpop.permute.xlu0 %1273 }
 0x1d3   :  { %4869 = vst [vmem:[#allocation75_spill] sm:$0xff] %v3726_v31  ;;  %1853 = vrot.lane.b32.xlu0 %v1812_v56, %s2753_s29  ;;  %v993_v7 = vpop.permute.xlu1 %992  ;;  %v126_v31 = vmul.f32 %v3190_v57, %v2965_v27  ;;  %v330_v56 = vmul.f32 %v3250_v44, %v2965_v27 }
 0x1d4   :  { %496 = vrot.lane.b32.xlu1 %v455_v41, %s2750_s27 }
 0x1d6   :  { %v3734_v48 = vpop.permute.xlu0 %368 }
 0x1d7   :  { %4870 = vst [vmem:[#allocation76_spill] sm:$0xff] %v3734_v48  ;;  %2041 = vrot.lane.b32.xlu0 %v2002_v23, %s2755_s15  ;;  %v3739_v26 = vpop.permute.xlu1 %1465  ;;  %v963_v48 = vmul.f32 %v3174_v39, %v3110_v36  ;;  %v270_v23 = vadd.f32 %v3431_v12, %v126_v31  ;;  %v838_v31 = vmul.f32 %v3104_v33, %v2965_v27 }
 0x1d8   :  { %4871 = vst [vmem:[#allocation77_spill] sm:$0xff] %v3739_v26  ;;  %748 = vrot.lane.b32.xlu1 %v709_v49, %s2753_s29  ;;  %v584_v26 = vmul.f32 %v3258_v21, %v2965_v27  ;;  %v127_v49 = vmul.f32 %v3190_v57, %v3110_v36  ;;  %v3785_v27 = vld [vmem:[%s4761_s0] sm:$0xff] }
 0x1da   :  { %v3746_v41 = vpop.permute.xlu0 %620  ;;  %v271_v12 = vadd.f32 %v3441_v46, %v127_v49  ;;  %v3803_v49 = vld [vmem:[%s4761_s0 + $0x10] sm:$0xff] }
 0x1db   :  { %4872 = vst [vmem:[#allocation78_spill] sm:$0xff] %v3746_v41  ;;  %374 = vrot.lane.b32.xlu0 %v330_v56, %s2749_s26  ;;  %v3751_v52 = vpop.permute.xlu1 %1653  ;;  %v1430_v41 = vmul.f32 %v3153_v61, %v3140_v55  ;;  %v1620_v61 = vmul.f32 %v3164_v22, %v3140_v55 }
 0x1dc   :  { %4873 = vst [vmem:[#allocation79_spill] sm:$0xff] %v3751_v52  ;;  %1000 = vrot.lane.b32.xlu1 %v963_v48, %s2755_s15  ;;  %v398_v52 = vadd.f32 %v3227_v28, %v270_v23  ;;  %v399_v36 = vadd.f32 %v3461_v2, %v271_v12  ;;  %v1092_v2 = vmul.f32 %v3785_v27, %v3270_v30 }
 0x1dd   :  { %v1810_v23 = vmul.f32 %v2934_v18, %v3140_v55  ;;  %v2000_v18 = vmul.f32 %v3174_v39, %v3140_v55 }
 0x1de   :  { %v3759_v9 = vpop.permute.xlu0 %872  ;;  %v526_v28 = vadd.f32 %v3262_v47, %v398_v52  ;;  %v527_v46 = vadd.f32 %v3491_v43, %v399_v36  ;;  %v1387_v36 = vmul.f32 %v3803_v49, %v3190_v57 }
 0x1df   :  { %626 = vrot.lane.b32.xlu0 %v584_v26, %s2751_s28  ;;  %v3764_v56 = vpop.permute.xlu1 %1841 }
 0x1e0   :  { %1473 = vrot.lane.b32.xlu1 %v1430_v41, %s2748_s23  ;;  %v655_v22 = vadd.f32 %v3533_v6, %v527_v46  ;;  %v654_v52 = vadd.f32 %v3314_v37, %v526_v28  ;;  %v1527_v6 = vmul.f32 %v3803_v49, %v3250_v44  ;;  %v1388_v28 = vmul.f32 %v3190_v57, %v3140_v55 }
 0x1e1   :  { %v582_v55 = vmul.f32 %v3785_v27, %v2940_v20  ;;  %v1499_v57 = vadd.f32 %v3215_v14, %v1387_v36  ;;  %v836_v14 = vmul.f32 %v3785_v27, %v3199_v8 }
 0x1e2   :  { %v3772_v48 = vpop.permute.xlu0 %1124  ;;  %v783_v43 = vadd.f32 %v3591_v53, %v655_v22  ;;  %v782_v37 = vadd.f32 %v3370_v1, %v654_v52  ;;  %v328_v1 = vmul.f32 %v3785_v27, %v3186_v13  ;;  %v1500_v22 = vadd.f32 %v3451_v59, %v1388_v28 }
 0x1e3   :  { %878 = vrot.lane.b32.xlu0 %v838_v31, %s2754_s14  ;;  %v3777_v26 = vpop.permute.xlu1 %2029 }
 0x1e4   :  { %1661 = vrot.lane.b32.xlu1 %v1620_v61, %s2750_s27  ;;  %v911_v31 = vadd.f32 %v3436_v17, %v783_v43  ;;  %v1717_v61 = vmul.f32 %v3803_v49, %v3258_v21  ;;  %v910_v39 = vadd.f32 %v3651_v11, %v782_v37  ;;  %v2097_v37 = vmul.f32 %v3803_v49, %v3270_v30 }
 0x1e6   :  { %v3790_v41 = vpop.permute.xlu0 %1565  ;;  %v1039_v46 = vadd.f32 %v993_v7, %v911_v31  ;;  %v1596_v7 = vadd.f32 %v3471_v29, %v1500_v22  ;;  %v1038_v52 = vadd.f32 %v3508_v15, %v910_v39  ;;  %v1595_v29 = vadd.f32 %v3242_v35, %v1499_v57 }
 0x1e7   :  { %4874 = vst [vmem:[#allocation80_spill] sm:$0xff] %v3790_v41  ;;  %1130 = vrot.lane.b32.xlu0 %v1092_v2, %s2756_s16  ;;  %v3795_v47 = vpop.permute.xlu1 %362  ;;  %v204_v35 = vmul.f32 %v3785_v27, %v3282_v34  ;;  %v4894_v41 = vld [vmem:[#allocation15_spill] sm:$0xff] }
 0x1e8   :  { %1849 = vrot.lane.b32.xlu1 %v1810_v23, %s2753_s29  ;;  %v1907_v23 = vmul.f32 %v3803_v49, %v3104_v33  ;;  %v1167_v11 = vadd.f32 %v3596_v4, %v1039_v46 }
 0x1ea   :  { %v3807_v12 = vpop.permute.xlu0 %1753  ;;  %v1297_v36 = vadd.f32 %v3409_v45, %v1167_v11  ;;  %v1525_v11 = vmul.f32 %v3803_v49, %v3186_v13 }
 0x1eb   :  { %4875 = vst [vmem:[#allocation81_spill] sm:$0xff] %v3807_v12  ;;  %1571 = vrot.lane.b32.xlu0 %v1527_v6, %s2749_s26  ;;  %v3812_v53 = vpop.permute.xlu1 %614  ;;  %v1692_v6 = vadd.f32 %v3513_v58, %v1596_v7 }
 0x1ec   :  { %2037 = vrot.lane.b32.xlu1 %v2000_v18, %s2755_s15 }
 0x1ed   :  { %v1788_v4 = vadd.f32 %v3551_v51, %v1692_v6  ;;  %v1715_v6 = vmul.f32 %v3803_v49, %v2940_v20  ;;  %v2708_v20 = vld [vmem:[%s4763_s2] sm:$0xff] }
 0x1ee   :  { %v3824_v2 = vpop.permute.xlu0 %1941 }
 0x1ef   :  { %1759 = vrot.lane.b32.xlu0 %v1717_v61, %s2751_s28  ;;  %v3829_v17 = vpop.permute.xlu1 %866  ;;  %v1691_v61 = vadd.f32 %v3288_v62, %v1595_v29  ;;  %v1884_v28 = vadd.f32 %v3621_v63, %v1788_v4  ;;  %v4878_v62 = vmov 0.0|0.0  }
 0x1f0   :  { %370 = vrot.lane.b32.xlu1 %v328_v1, %s2749_s26  ;;  %v1090_v1 = vmul.f32 %v3785_v27, %v3208_v25 }
 0x1f1   :  { %v1787_v51 = vadd.f32 %v3342_v40, %v1691_v61  ;;  %v458_v40 = vmul.f32 %v3785_v27, %v3008_v42 }
 0x1f2   :  { %v3840_v43 = vpop.permute.xlu0 %2129 }
 0x1f3   :  { %1947 = vrot.lane.b32.xlu0 %v1907_v23, %s2754_s14  ;;  %v1119_v59 = vpop.permute.xlu1 %1118  ;;  %v1883_v63 = vadd.f32 %v3400_v16, %v1787_v51  ;;  %v1980_v23 = vadd.f32 %v3466_v50, %v1884_v28  ;;  %v712_v16 = vmul.f32 %v3785_v27, %v3293_v0 }
 0x1f4   :  { %v1166_v18 = vadd.f32 %v1119_v59, %v1038_v52  ;;  %622 = vrot.lane.b32.xlu1 %v582_v55, %s2751_s28 }
 0x1f5   :  { %v1979_v55 = vadd.f32 %v3681_v54, %v1883_v63  ;;  %v2076_v57 = vadd.f32 %v3777_v26, %v1980_v23  ;;  %v4879_v54 = vld [vmem:[#allocation48_spill] sm:$0xff]  ;;  %v1623_v63 = vmul.f32 %v3803_v49, %v3008_v42 }
 0x1f6   :  { %v3852_v31 = vpop.permute.xlu0 %242  ;;  %v1296_v15 = vadd.f32 %v3409_v45, %v1166_v18 }
 0x1f7   :  { %4876 = vst [vmem:[#allocation82_spill] sm:$0xff] %v3852_v31  ;;  %2135 = vrot.lane.b32.xlu0 %v2097_v37, %s2756_s16  ;;  %v3857_v58 = vpop.permute.xlu1 %1559  ;;  %v2172_v50 = vadd.f32 %v3636_v38, %v2076_v57  ;;  %v2075_v26 = vadd.f32 %v4879_v54, %v1979_v55  ;;  %v4880_v37 = vld [vmem:[#allocation18_spill] sm:$0xff]  ;;  %v1905_v38 = vmul.f32 %v3803_v49, %v3199_v8 }
 0x1f8   :  { %874 = vrot.lane.b32.xlu1 %v836_v14, %s2754_s14  ;;  %v2562_v39 = vpack.c.bf16 %v1297_v36, %v1296_v15  ;;  %v966_v14 = vmul.f32 %v3785_v27, %v4880_v37  ;;  %v1183_v36 = vcombine.high %v2708_v20, %v2708_v20  ;;  %v1813_v57 = vmul.f32 %v3803_v49, %v3293_v0  ;;  %v3968_v20 = vld [vmem:[%s4761_s0 + $0x8] sm:$0xff] }
 0x1f9   :  { %v2188_v15 = vadd.f32 %v2172_v50, %v3409_v45 }
 0x1fa   :  { %v3865_v46 = vpop.permute.xlu0 %494  ;;  %2563 = vmatpush3.bf16.msra.mxu0 %v2562_v39  ;;  %v1433_v39 = vmul.f32 %v3803_v49, %v3282_v34 }
 0x1fb   :  { %4877 = vst [vmem:[#allocation83_spill] sm:$0xff] %v3865_v46  ;;  %250 = vrot.lane.b32.xlu0 %v204_v35, %s2748_s23  ;;  %v3870_v22 = vpop.permute.xlu1 %1747  ;;  %2564 = vmatprep.subr.bf16.mxu0 %v4878_v62  ;;  %v4882_v35 = vld [vmem:[#allocation8_spill] sm:$0xff]  ;;  %v4895_v46 = vld [vmem:[#allocation17_spill] sm:$0xff] }
 0x1fc   :  { %1126 = vrot.lane.b32.xlu1 %v1090_v1, %s2756_s16  ;;  %v1197_v51 = vrot.slane %v1183_v36, %v4882_v35  ;;  %v4887_v36 = vld [vmem:[#allocation7_spill] sm:$0xff] }
 0x1fe   :  { %v3880_v7 = vpop.permute.xlu0 %746  ;;  %v1199_v55 = vcombine.high %v1197_v51, %v1197_v51 }
 0x1ff   :  { %502 = vrot.lane.b32.xlu0 %v458_v40, %s2750_s27  ;;  %v3885_v52 = vpop.permute.xlu1 %1935  ;;  %v202_v40 = vmul.f32 %v3785_v27, %v2981_v32 }
 0x200   :  { %1567 = vrot.lane.b32.xlu1 %v1525_v11, %s2749_s26  ;;  %v3945_v54 = vrot.slane %v1199_v55, %v4882_v35 }
 0x202   :  { %v3891_v59 = vpop.permute.xlu0 %998 }
 0x203   :  { %754 = vrot.lane.b32.xlu0 %v712_v16, %s2753_s29  ;;  %v2124_v13 = vpop.permute.xlu1 %2123  ;;  %v456_v16 = vmul.f32 %v3785_v27, %v3220_v3 }
 0x204   :  { %v2171_v18 = vadd.f32 %v2124_v13, %v2075_v26  ;;  %1755 = vrot.lane.b32.xlu1 %v1715_v6, %s2751_s28  ;;  %v2003_v26 = vmul.f32 %v3803_v49, %v4880_v37  ;;  %v710_v13 = vmul.f32 %v3785_v27, %v3234_v19 }
 0x206   :  { %v3900_v29 = vpop.permute.xlu0 %1471  ;;  %v2187_v4 = vadd.f32 %v2171_v18, %v3409_v45  ;;  %v2095_v45 = vmul.f32 %v3803_v49, %v3208_v25 }
 0x207   :  { %1006 = vrot.lane.b32.xlu0 %v966_v14, %s2755_s15  ;;  %v3910_v61 = vpop.permute.xlu1 %119  ;;  %v1255_v14 = vrot.slane %v3945_v54, %v3093_v24 }
 0x208   :  { %1943 = vrot.lane.b32.xlu1 %v1905_v38, %s2754_s14  ;;  %v2586_v28 = vpack.c.bf16 %v2188_v15, %v2187_v4  ;;  %v964_v4 = vmul.f32 %v3785_v27, %v3055_v60 }
 0x20a   :  { %v3915_v8 = vpop.permute.xlu0 %1659  ;;  %2587 = vmatpush3.bf16.msra.mxu1 %v2586_v28  ;;  %v333_v28 = vmul.f32 %v3968_v20, %v4887_v36 }
 0x20b   :  { %4881 = vst [vmem:[#allocation48_spill] sm:$0xff] %v3915_v8  ;;  %1479 = vrot.lane.b32.xlu0 %v1433_v39, %s2748_s23  ;;  %v3921_v1 = vpop.permute.xlu1 %240  ;;  %2588 = vmatprep.subr.bf16.mxu1 %v4878_v62 }
 0x20c   :  { %4883 = vst [vmem:[#allocation18_spill] sm:$0xff] %v3921_v1  ;;  %2131 = vrot.lane.b32.xlu1 %v2095_v45, %s2756_s16  ;;  %v1431_v45 = vmul.f32 %v3803_v49, %v2981_v32  ;;  %v1621_v32 = vmul.f32 %v3803_v49, %v3220_v3  ;;  %v1811_v3 = vmul.f32 %v3803_v49, %v3234_v19 }
 0x20d   :  { %v2001_v19 = vmul.f32 %v3803_v49, %v3055_v60 }
 0x20e   :  { %v3927_v23 = vpop.permute.xlu0 %1847 }
 0x20f   :  { %4884 = vst [vmem:[#allocation8_spill] sm:$0xff] %v3927_v23  ;;  %1667 = vrot.lane.b32.xlu0 %v1623_v63, %s2750_s27  ;;  %v3932_v25 = vpop.permute.xlu1 %492  ;;  %v331_v23 = vmul.f32 %v3968_v20, %v3250_v44 }
 0x210   :  { %246 = vrot.lane.b32.xlu1 %v202_v40, %s2748_s23  ;;  %v4889_v40 = vld [vmem:[#allocation14_spill] sm:$0xff] }
 0x211   :  { %v129_v55 = vmul.f32 %v3968_v20, %v4889_v40 }
 0x212   :  { %v3937_v11 = vpop.permute.xlu0 %2035 }
 0x213   :  { %1855 = vrot.lane.b32.xlu0 %v1813_v57, %s2753_s29  ;;  %v3942_v50 = vpop.permute.xlu1 %744  ;;  %v4890_v57 = vld [vmem:[#allocation19_spill] sm:$0xff] }
 0x214   :  { %498 = vrot.lane.b32.xlu1 %v456_v16, %s2750_s27  ;;  %v587_v16 = vmul.f32 %v3968_v20, %v4890_v57 }
 0x216   :  { %v3950_v6 = vpop.permute.xlu0 %1277 }
 0x217   :  { %2043 = vrot.lane.b32.xlu0 %v2003_v26, %s2755_s15  ;;  %v997_v18 = vpop.permute.xlu1 %996  ;;  %v128_v26 = vmul.f32 %v3785_v27, %v4889_v40 }
 0x218   :  { %750 = vrot.lane.b32.xlu1 %v710_v13, %s2753_s29  ;;  %v4891_v13 = vld [vmem:[#allocation39_spill] sm:$0xff] }
 0x21a   :  { %v3958_v38 = vpop.permute.xlu0 %372 }
 0x21b   :  { %4885 = vst [vmem:[#allocation84_spill] sm:$0xff] %v3958_v38  ;;  %1285 = vperm.xlu0 %2696, %v1255_v14   ;;  %v3962_v15 = vpop.permute.xlu1 %1469  ;;  %v273_v14 = vadd.f32 %v4891_v13, %v129_v55  ;;  %v4892_v38 = vld [vmem:[#allocation44_spill] sm:$0xff] }
 0x21c   :  { %4886 = vst [vmem:[#allocation85_spill] sm:$0xff] %v3962_v15  ;;  %1002 = vrot.lane.b32.xlu1 %v964_v4, %s2755_s15  ;;  %v272_v15 = vadd.f32 %v4894_v41, %v128_v26  ;;  %v4898_v26 = vld [vmem:[#allocation35_spill] sm:$0xff] }
 0x21d   :  { %v401_v31 = vadd.f32 %v4892_v38, %v273_v14  ;;  %v4010_v14 = vrot.slane %v1197_v51, %v4882_v35 }
 0x21e   :  { %v3972_v39 = vpop.permute.xlu0 %624  ;;  %v400_v38 = vadd.f32 %v4895_v46, %v272_v15 }
 0x21f   :  { %4888 = vst [vmem:[#allocation7_spill] sm:$0xff] %v3972_v39  ;;  %380 = vrot.lane.b32.xlu0 %v333_v28, %s2749_s26  ;;  %v3977_v63 = vpop.permute.xlu1 %1657  ;;  %v529_v55 = vadd.f32 %v3581_v10, %v401_v31  ;;  %v4897_v10 = vld [vmem:[#allocation26_spill] sm:$0xff]  ;;  %v1251_v51 = vrot.slane %v4010_v14, %v3093_v24 }
 0x220   :  { %1475 = vrot.lane.b32.xlu1 %v1431_v45, %s2748_s23  ;;  %v4893_v45 = vld [vmem:[#allocation20_spill] sm:$0xff]  ;;  %v528_v31 = vadd.f32 %v4897_v10, %v400_v38  ;;  %v4904_v10 = vld [vmem:[#allocation54_spill] sm:$0xff] }
 0x221   :  { %v841_v8 = vmul.f32 %v3968_v20, %v4893_v45  ;;  %v657_v39 = vadd.f32 %v4898_v26, %v529_v55  ;;  %v4031_v55 = vld [vmem:[%s4761_s0 + $0x18] sm:$0xff]  ;;  %v1389_v26 = vmul.f32 %v3803_v49, %v4889_v40 }
 0x222   :  { %v3987_v4 = vpop.permute.xlu0 %876  ;;  %v1530_v60 = vmul.f32 %v4031_v55, %v4887_v36 }
 0x223   :  { %632 = vrot.lane.b32.xlu0 %v587_v16, %s2751_s28  ;;  %v3992_v28 = vpop.permute.xlu1 %1845  ;;  %v785_v35 = vadd.f32 %v3721_v5, %v657_v39  ;;  %v1390_v5 = vmul.f32 %v4031_v55, %v4889_v40  ;;  %v4903_v39 = vld [vmem:[#allocation41_spill] sm:$0xff]  ;;  %v1910_v40 = vmul.f32 %v4031_v55, %v4893_v45 }
 0x224   :  { %1663 = vrot.lane.b32.xlu1 %v1621_v32, %s2750_s27  ;;  %v4896_v32 = vld [vmem:[#allocation11_spill] sm:$0xff] }
 0x225   :  { %v1095_v41 = vmul.f32 %v3968_v20, %v4896_v32  ;;  %v2100_v12 = vmul.f32 %v4031_v55, %v4896_v32 }
 0x226   :  { %v4000_v13 = vpop.permute.xlu0 %1128 }
 0x227   :  { %884 = vrot.lane.b32.xlu0 %v841_v8, %s2754_s14  ;;  %v4005_v16 = vpop.permute.xlu1 %2033  ;;  %v4901_v8 = vld [vmem:[#allocation61_spill] sm:$0xff] }
 0x228   :  { %1851 = vrot.lane.b32.xlu1 %v1811_v3, %s2753_s29  ;;  %v656_v15 = vadd.f32 %v4901_v8, %v528_v31  ;;  %v913_v31 = vadd.f32 %v4904_v10, %v785_v35  ;;  %v4905_v8 = vld [vmem:[#allocation42_spill] sm:$0xff]  ;;  %v4907_v35 = vld [vmem:[#allocation47_spill] sm:$0xff] }
 0x22a   :  { %v4016_v1 = vpop.permute.xlu0 %1569 }
 0x22b   :  { %4899 = vst [vmem:[#allocation14_spill] sm:$0xff] %v4016_v1  ;;  %1136 = vrot.lane.b32.xlu0 %v1095_v41, %s2756_s16  ;;  %v4021_v46 = vpop.permute.xlu1 %366  ;;  %v784_v41 = vadd.f32 %v4903_v39, %v656_v15  ;;  %v4909_v39 = vld [vmem:[#allocation57_spill] sm:$0xff] }
 0x22c   :  { %4900 = vst [vmem:[#allocation19_spill] sm:$0xff] %v4021_v46  ;;  %2039 = vrot.lane.b32.xlu1 %v2001_v19, %s2755_s15  ;;  %v1720_v19 = vmul.f32 %v4031_v55, %v4890_v57  ;;  %v1041_v46 = vadd.f32 %v997_v18, %v913_v31  ;;  %v4908_v18 = vld [vmem:[#allocation16_spill] sm:$0xff] }
 0x22e   :  { %v4035_v3 = vpop.permute.xlu0 %1757  ;;  %v1169_v10 = vadd.f32 %v3772_v48, %v1041_v46  ;;  %v4913_v46 = vld [vmem:[#allocation37_spill] sm:$0xff] }
 0x22f   :  { %4902 = vst [vmem:[#allocation39_spill] sm:$0xff] %v4035_v3  ;;  %1577 = vrot.lane.b32.xlu0 %v1530_v60, %s2749_s26  ;;  %v4038_v38 = vpop.permute.xlu1 %618  ;;  %v1502_v3 = vadd.f32 %v4905_v8, %v1390_v5  ;;  %v912_v60 = vadd.f32 %v3829_v17, %v784_v41  ;;  %v585_v17 = vmul.f32 %v3968_v20, %v3258_v21 }
 0x230   :  { %1281 = vperm.xlu1 %2697, %v1251_v51   ;;  %v1501_v5 = vadd.f32 %v4908_v18, %v1389_v26  ;;  %v839_v26 = vmul.f32 %v3968_v20, %v3104_v33 }
 0x231   :  { %v1598_v51 = vadd.f32 %v4907_v35, %v1502_v3 }
 0x232   :  { %v4050_v1 = vpop.permute.xlu0 %1945 }
 0x233   :  { %4906 = vst [vmem:[#allocation44_spill] sm:$0xff] %v4050_v1  ;;  %1765 = vrot.lane.b32.xlu0 %v1720_v19, %s2751_s28  ;;  %v4055_v15 = vpop.permute.xlu1 %870  ;;  %v1694_v41 = vadd.f32 %v4909_v39, %v1598_v51  ;;  %v4910_v19 = vld [vmem:[#allocation67_spill] sm:$0xff]  ;;  %v4912_v51 = vld [vmem:[#allocation30_spill] sm:$0xff]  ;;  %v4914_v39 = vld [vmem:[#allocation49_spill] sm:$0xff] }
 0x234   :  { %376 = vrot.lane.b32.xlu1 %v331_v23, %s2749_s26  ;;  %v1040_v8 = vadd.f32 %v4910_v19, %v912_v60  ;;  %v4911_v23 = vld [vmem:[#allocation21_spill] sm:$0xff]  ;;  %v1299_v60 = vadd.f32 %v4914_v39, %v1169_v10  ;;  %v4920_v10 = vld [vmem:[#allocation46_spill] sm:$0xff] }
 0x235   :  { %v1597_v35 = vadd.f32 %v4911_v23, %v1501_v5  ;;  %v1790_v18 = vadd.f32 %v4913_v46, %v1694_v41  ;;  %v4922_v46 = vld [vmem:[#allocation23_spill] sm:$0xff] }
 0x236   :  { %v4066_v31 = vpop.permute.xlu0 %2133 }
 0x237   :  { %1953 = vrot.lane.b32.xlu0 %v1910_v40, %s2754_s14  ;;  %v1123_v3 = vpop.permute.xlu1 %1122  ;;  %v1693_v48 = vadd.f32 %v4912_v51, %v1597_v35  ;;  %v4918_v35 = vld [vmem:[#allocation22_spill] sm:$0xff] }
 0x238   :  { %v1168_v1 = vadd.f32 %v1123_v3, %v1040_v8  ;;  %628 = vrot.lane.b32.xlu1 %v585_v17, %s2751_s28  ;;  %v4917_v17 = vld [vmem:[#allocation66_spill] sm:$0xff]  ;;  %v1886_v3 = vadd.f32 %v3764_v56, %v1790_v18  ;;  %v461_v41 = vmul.f32 %v3968_v20, %v4918_v35  ;;  %v715_v18 = vmul.f32 %v3968_v20, %v4922_v46 }
 0x239   :  { %v1789_v8 = vadd.f32 %v4917_v17, %v1693_v48  ;;  %v4921_v48 = vld [vmem:[#allocation59_spill] sm:$0xff] }
 0x23a   :  { %v1298_v40 = vadd.f32 %v4914_v39, %v1168_v1  ;;  %v4080_v19 = vpop.permute.xlu0 %248  ;;  %v1093_v1 = vmul.f32 %v3968_v20, %v3270_v30 }
 0x23b   :  { %4915 = vst [vmem:[#allocation20_spill] sm:$0xff] %v4080_v19  ;;  %2141 = vrot.lane.b32.xlu0 %v2100_v12, %s2756_s16  ;;  %v4083_v5 = vpop.permute.xlu1 %1563  ;;  %v1885_v56 = vadd.f32 %v4920_v10, %v1789_v8  ;;  %v4924_v8 = vld [vmem:[#allocation9_spill] sm:$0xff] }
 0x23c   :  { %4916 = vst [vmem:[#allocation15_spill] sm:$0xff] %v4083_v5  ;;  %880 = vrot.lane.b32.xlu1 %v839_v26, %s2754_s14  ;;  %v2565_v23 = vpack.c.bf16 %v1299_v60, %v1298_v40  ;;  %v1982_v26 = vadd.f32 %v4921_v48, %v1886_v3  ;;  %v969_v3 = vmul.f32 %v3968_v20, %v4924_v8  ;;  %v4947_v19 = vld [vmem:[#allocation73_spill] sm:$0xff] }
 0x23d   :  { %v1981_v60 = vadd.f32 %v3885_v52, %v1885_v56  ;;  %v4925_v52 = vld [vmem:[#allocation74_spill] sm:$0xff]  ;;  %v1718_v56 = vmul.f32 %v4031_v55, %v3258_v21 }
 0x23e   :  { %v4090_v51 = vpop.permute.xlu0 %500  ;;  %2566 = vmatpush3.bf16.msra.mxu0 %v2565_v23  ;;  %v2078_v40 = vadd.f32 %v4005_v16, %v1982_v26  ;;  %v1528_v23 = vmul.f32 %v4031_v55, %v3250_v44  ;;  %v1626_v26 = vmul.f32 %v4031_v55, %v4918_v35 }
 0x23f   :  { %4919 = vst [vmem:[#allocation17_spill] sm:$0xff] %v4090_v51  ;;  %508 = vrot.lane.b32.xlu0 %v461_v41, %s2750_s27  ;;  %v4095_v12 = vpop.permute.xlu1 %1751  ;;  %2567 = vmatprep.subr.bf16.mxu0 %v4878_v62  ;;  %v2077_v16 = vadd.f32 %v4925_v52, %v1981_v60  ;;  %v1908_v60 = vmul.f32 %v4031_v55, %v3104_v33 }
 0x240   :  { %1132 = vrot.lane.b32.xlu1 %v1093_v1, %s2756_s16  ;;  %v2174_v1 = vadd.f32 %v3840_v43, %v2078_v40  ;;  %v2006_v33 = vmul.f32 %v4031_v55, %v4924_v8 }
 0x242   :  { %v4105_v17 = vpop.permute.xlu0 %752 }
 0x243   :  { %4923 = vst [vmem:[#allocation11_spill] sm:$0xff] %v4105_v17  ;;  %760 = vrot.lane.b32.xlu0 %v715_v18, %s2753_s29  ;;  %v4110_v41 = vpop.permute.xlu1 %1939  ;;  %v2190_v18 = vadd.f32 %v2174_v1, %v4914_v39 }
 0x244   :  { %1573 = vrot.lane.b32.xlu1 %v1528_v23, %s2749_s26 }
 0x246   :  { %v4116_v10 = vpop.permute.xlu0 %1004 }
 0x247   :  { %1012 = vrot.lane.b32.xlu0 %v969_v3, %s2755_s15  ;;  %v2128_v44 = vpop.permute.xlu1 %2127  ;;  %v1816_v3 = vmul.f32 %v4031_v55, %v4922_v46 }
 0x248   :  { %v2173_v48 = vadd.f32 %v2128_v44, %v2077_v16  ;;  %1761 = vrot.lane.b32.xlu1 %v1718_v56, %s2751_s28  ;;  %v205_v56 = vmul.f32 %v3968_v20, %v3282_v34 }
 0x24a   :  { %v2189_v43 = vadd.f32 %v2173_v48, %v4914_v39  ;;  %v4127_v40 = vpop.permute.xlu0 %1477  ;;  %v2098_v39 = vmul.f32 %v4031_v55, %v3270_v30  ;;  %v4932_v30 = vld [vmem:[#allocation25_spill] sm:$0xff] }
 0x24b   :  { %4926 = vst [vmem:[#allocation26_spill] sm:$0xff] %v4127_v40  ;;  %1673 = vrot.lane.b32.xlu0 %v1626_v26, %s2750_s27  ;;  %v4132_v21 = vpop.permute.xlu1 %123  ;;  %v588_v48 = vmul.f32 %v3785_v27, %v4932_v30  ;;  %v4946_v40 = vld [vmem:[#allocation60_spill] sm:$0xff] }
 0x24c   :  { %4927 = vst [vmem:[#allocation35_spill] sm:$0xff] %v4132_v21  ;;  %1949 = vrot.lane.b32.xlu1 %v1908_v60, %s2754_s14  ;;  %v2589_v23 = vpack.c.bf16 %v2190_v18, %v2189_v43  ;;  %v459_v18 = vmul.f32 %v3968_v20, %v3008_v42  ;;  %v4934_v60 = vld [vmem:[#allocation27_spill] sm:$0xff] }
 0x24e   :  { %v4137_v52 = vpop.permute.xlu0 %1665  ;;  %2590 = vmatpush3.bf16.msra.mxu1 %v2589_v23  ;;  %v842_v23 = vmul.f32 %v3785_v27, %v4934_v60 }
 0x24f   :  { %4928 = vst [vmem:[#allocation61_spill] sm:$0xff] %v4137_v52  ;;  %1861 = vrot.lane.b32.xlu0 %v1816_v3, %s2753_s29  ;;  %v4142_v1 = vpop.permute.xlu1 %244  ;;  %2591 = vmatprep.subr.bf16.mxu1 %v4878_v62 }
 0x250   :  { %4929 = vst [vmem:[#allocation41_spill] sm:$0xff] %v4142_v1  ;;  %2137 = vrot.lane.b32.xlu1 %v2098_v39, %s2756_s16  ;;  %v713_v39 = vmul.f32 %v3968_v20, %v3293_v0 }
 0x252   :  { %v4148_v16 = vpop.permute.xlu0 %1853 }
 0x253   :  { %4930 = vst [vmem:[#allocation54_spill] sm:$0xff] %v4148_v16  ;;  %2049 = vrot.lane.b32.xlu0 %v2006_v33, %s2755_s15  ;;  %v4153_v44 = vpop.permute.xlu1 %496  ;;  %v4939_v16 = vld [vmem:[#allocation5_spill] sm:$0xff] }
 0x254   :  { %4931 = vst [vmem:[#allocation42_spill] sm:$0xff] %v4153_v44  ;;  %252 = vrot.lane.b32.xlu1 %v205_v56, %s2748_s23  ;;  %v4936_v56 = vld [vmem:[#allocation12_spill] sm:$0xff]  ;;  %v130_v44 = vmul.f32 %v3785_v27, %v4939_v16 }
 0x256   :  { %v4158_v26 = vpop.permute.xlu0 %2041 }
 0x257   :  { %4933 = vst [vmem:[#allocation47_spill] sm:$0xff] %v4158_v26  ;;  %634 = vrot.lane.b32.xlu0 %v588_v48, %s2751_s28  ;;  %v4163_v43 = vpop.permute.xlu1 %748  ;;  %v1096_v48 = vmul.f32 %v3785_v27, %v4936_v56 }
 0x258   :  { %504 = vrot.lane.b32.xlu1 %v459_v18, %s2750_s27  ;;  %v967_v18 = vmul.f32 %v3968_v20, %v4880_v37 }
 0x25a   :  { %v4168_v3 = vpop.permute.xlu0 %374 }
 0x25b   :  { %4935 = vst [vmem:[#allocation16_spill] sm:$0xff] %v4168_v3  ;;  %886 = vrot.lane.b32.xlu0 %v842_v23, %s2754_s14  ;;  %v1001_v33 = vpop.permute.xlu1 %1000  ;;  %v1721_v23 = vmul.f32 %v3803_v49, %v4932_v30 }
 0x25c   :  { %756 = vrot.lane.b32.xlu1 %v713_v39, %s2753_s29  ;;  %v131_v39 = vmul.f32 %v3968_v20, %v4939_v16 }
 0x25e   :  { %v4176_v51 = vpop.permute.xlu0 %626 }
 0x25f   :  { %4937 = vst [vmem:[#allocation57_spill] sm:$0xff] %v4176_v51  ;;  %1138 = vrot.lane.b32.xlu0 %v1096_v48, %s2756_s16  ;;  %v4181_v1 = vpop.permute.xlu1 %1473  ;;  %v1434_v51 = vmul.f32 %v4031_v55, %v3282_v34  ;;  %v4942_v48 = vld [vmem:[#allocation52_spill] sm:$0xff] }
 0x260   :  { %4938 = vst [vmem:[#allocation67_spill] sm:$0xff] %v4181_v1  ;;  %1008 = vrot.lane.b32.xlu1 %v967_v18, %s2755_s15  ;;  %v275_v3 = vadd.f32 %v4942_v48, %v131_v39  ;;  %v1911_v18 = vmul.f32 %v3803_v49, %v4934_v60  ;;  %v4945_v39 = vld [vmem:[#allocation33_spill] sm:$0xff] }
 0x262   :  { %v4188_v5 = vpop.permute.xlu0 %878  ;;  %v403_v48 = vadd.f32 %v4945_v39, %v275_v3  ;;  %v4949_v3 = vld [vmem:[#allocation40_spill] sm:$0xff]  ;;  %v4950_v39 = vld [vmem:[#allocation53_spill] sm:$0xff] }
 0x263   :  { %4940 = vst [vmem:[#allocation21_spill] sm:$0xff] %v4188_v5  ;;  %1767 = vrot.lane.b32.xlu0 %v1721_v23, %s2751_s28  ;;  %v4193_v17 = vpop.permute.xlu1 %1661  ;;  %v1624_v5 = vmul.f32 %v4031_v55, %v3008_v42  ;;  %v4944_v23 = vld [vmem:[#allocation50_spill] sm:$0xff]  ;;  %v1814_v42 = vmul.f32 %v4031_v55, %v3293_v0 }
 0x264   :  { %4941 = vst [vmem:[#allocation30_spill] sm:$0xff] %v4193_v17  ;;  %1481 = vrot.lane.b32.xlu1 %v1434_v51, %s2748_s23  ;;  %v274_v17 = vadd.f32 %v4944_v23, %v130_v44  ;;  %v2101_v51 = vmul.f32 %v3803_v49, %v4936_v56  ;;  %v531_v21 = vadd.f32 %v4947_v19, %v403_v48  ;;  %v4948_v44 = vld [vmem:[#allocation29_spill] sm:$0xff] }
 0x265   :  { %v2004_v19 = vmul.f32 %v4031_v55, %v4880_v37  ;;  %v332_v37 = vmul.f32 %v3785_v27, %v4887_v36 }
 0x266   :  { %v4201_v52 = vpop.permute.xlu0 %1130  ;;  %v402_v1 = vadd.f32 %v4946_v40, %v274_v17  ;;  %v659_v17 = vadd.f32 %v4950_v39, %v531_v21  ;;  %v1392_v21 = vmul.f32 %v4031_v55, %v4939_v16 }
 0x267   :  { %1955 = vrot.lane.b32.xlu0 %v1911_v18, %s2754_s14  ;;  %v4206_v34 = vpop.permute.xlu1 %1849 }
 0x268   :  { %4943 = vst [vmem:[#allocation37_spill] sm:$0xff] %v4206_v34  ;;  %1669 = vrot.lane.b32.xlu1 %v1624_v5, %s2750_s27  ;;  %v716_v5 = vmul.f32 %v3785_v27, %v4948_v44  ;;  %v530_v23 = vadd.f32 %v4949_v3, %v402_v1 }
 0x26a   :  { %v4215_v26 = vpop.permute.xlu0 %1571  ;;  %v658_v48 = vadd.f32 %v3812_v53, %v530_v23  ;;  %v4955_v53 = vld [vmem:[#allocation55_spill] sm:$0xff] }
 0x26b   :  { %2143 = vrot.lane.b32.xlu0 %v2101_v51, %s2756_s16  ;;  %v4220_v18 = vpop.permute.xlu1 %2037  ;;  %v787_v51 = vadd.f32 %v3942_v50, %v659_v17  ;;  %v1504_v23 = vadd.f32 %v4955_v53, %v1392_v21  ;;  %v4956_v50 = vld [vmem:[#allocation65_spill] sm:$0xff]  ;;  %v586_v21 = vmul.f32 %v3785_v27, %v4890_v57  ;;  %v4959_v53 = vld [vmem:[#allocation36_spill] sm:$0xff] }
 0x26c   :  { %1857 = vrot.lane.b32.xlu1 %v1814_v42, %s2753_s29  ;;  %v4952_v42 = vld [vmem:[#allocation31_spill] sm:$0xff]  ;;  %v786_v39 = vadd.f32 %v4956_v50, %v658_v48 }
 0x26d   :  { %v970_v1 = vmul.f32 %v3785_v27, %v4952_v42  ;;  %v915_v17 = vadd.f32 %v3759_v9, %v787_v51  ;;  %v1231_v9 = vcombine.high %v3945_v54, %v3945_v54  ;;  %v4958_v51 = vld [vmem:[#allocation28_spill] sm:$0xff]  ;;  %v1600_v50 = vadd.f32 %v4959_v53, %v1504_v23 }
 0x26e   :  { %v4227_v40 = vpop.permute.xlu0 %1759 }
 0x26f   :  { %762 = vrot.lane.b32.xlu0 %v716_v5, %s2753_s29  ;;  %v4232_v0 = vpop.permute.xlu1 %370  ;;  %v1043_v34 = vadd.f32 %v1001_v33, %v915_v17  ;;  %v4960_v33 = vld [vmem:[#allocation64_spill] sm:$0xff]  ;;  %v4961_v17 = vld [vmem:[#allocation79_spill] sm:$0xff]  ;;  %v1263_v23 = vrot.slane %v1231_v9, %v3093_v24 }
 0x270   :  { %4951 = vst [vmem:[#allocation49_spill] sm:$0xff] %v4232_v0  ;;  %2045 = vrot.lane.b32.xlu1 %v2004_v19, %s2755_s15  ;;  %v1817_v19 = vmul.f32 %v3803_v49, %v4948_v44  ;;  %v1391_v0 = vmul.f32 %v3803_v49, %v4939_v16  ;;  %v840_v16 = vmul.f32 %v3785_v27, %v4893_v45 }
 0x272   :  { %v4241_v3 = vpop.permute.xlu0 %1947 }
 0x273   :  { %4953 = vst [vmem:[#allocation66_spill] sm:$0xff] %v4241_v3  ;;  %1014 = vrot.lane.b32.xlu0 %v970_v1, %s2755_s15  ;;  %v4246_v5 = vpop.permute.xlu1 %622  ;;  %v914_v3 = vadd.f32 %v4055_v15, %v786_v39  ;;  %v2007_v15 = vmul.f32 %v3803_v49, %v4952_v42 }
 0x274   :  { %4954 = vst [vmem:[#allocation22_spill] sm:$0xff] %v4246_v5  ;;  %378 = vrot.lane.b32.xlu1 %v332_v37, %s2749_s26  ;;  %v1503_v37 = vadd.f32 %v4958_v51, %v1391_v0  ;;  %v1171_v5 = vadd.f32 %v4000_v13, %v1043_v34  ;;  %v1094_v51 = vmul.f32 %v3785_v27, %v4896_v32  ;;  %v4964_v13 = vld [vmem:[#allocation75_spill] sm:$0xff] }
 0x275   :  { %v1042_v54 = vadd.f32 %v3891_v59, %v914_v3 }
 0x276   :  { %v4257_v1 = vpop.permute.xlu0 %2135  ;;  %v1599_v39 = vadd.f32 %v4960_v33, %v1503_v37  ;;  %v4962_v37 = vld [vmem:[#allocation45_spill] sm:$0xff]  ;;  %v1301_v34 = vadd.f32 %v4964_v13, %v1171_v5  ;;  %v1529_v5 = vmul.f32 %v3803_v49, %v4887_v36 }
 0x277   :  { %4957 = vst [vmem:[#allocation46_spill] sm:$0xff] %v4257_v1  ;;  %1863 = vrot.lane.b32.xlu0 %v1817_v19, %s2753_s29  ;;  %v4262_v48 = vpop.permute.xlu1 %874  ;;  %v1696_v19 = vadd.f32 %v4961_v17, %v1600_v50  ;;  %v4963_v50 = vld [vmem:[#allocation58_spill] sm:$0xff] }
 0x278   :  { %630 = vrot.lane.b32.xlu1 %v586_v21, %s2751_s28  ;;  %v1695_v53 = vadd.f32 %v4962_v37, %v1599_v39 }
 0x279   :  { %v1792_v33 = vadd.f32 %v4963_v50, %v1696_v19  ;;  %v1719_v50 = vmul.f32 %v3803_v49, %v4890_v57 }
 0x27a   :  { %v4276_v1 = vpop.permute.xlu0 %250  ;;  %v1791_v9 = vadd.f32 %v3870_v22, %v1695_v53  ;;  %v4967_v22 = vld [vmem:[#allocation72_spill] sm:$0xff] }
 0x27b   :  { %2051 = vrot.lane.b32.xlu0 %v2007_v15, %s2755_s15  ;;  %v1127_v0 = vpop.permute.xlu1 %1126  ;;  %v1888_v15 = vadd.f32 %v3992_v28, %v1792_v33 }
 0x27c   :  { %v1170_v21 = vadd.f32 %v1127_v0, %v1042_v54  ;;  %882 = vrot.lane.b32.xlu1 %v840_v16, %s2754_s14  ;;  %v4965_v54 = vld [vmem:[#allocation10_spill] sm:$0xff]  ;;  %v1887_v28 = vadd.f32 %v4967_v22, %v1791_v9 }
 0x27d   :  { %v845_v39 = vmul.f32 %v3968_v20, %v4965_v54  ;;  %v4969_v22 = vld [vmem:[#allocation34_spill] sm:$0xff] }
 0x27e   :  { %v1300_v17 = vadd.f32 %v4964_v13, %v1170_v21  ;;  %v4288_v59 = vpop.permute.xlu0 %502  ;;  %v4968_v21 = vld [vmem:[#allocation32_spill] sm:$0xff]  ;;  %v1983_v37 = vadd.f32 %v4110_v41, %v1887_v28  ;;  %v973_v28 = vmul.f32 %v3968_v20, %v4969_v22 }
 0x27f   :  { %1293 = vperm.xlu0 %2696, %v1263_v23   ;;  %v4290_v3 = vpop.permute.xlu1 %1567  ;;  %v1984_v23 = vadd.f32 %v3824_v2, %v1888_v15  ;;  %v1914_v2 = vmul.f32 %v4031_v55, %v4965_v54  ;;  %v2104_v15 = vmul.f32 %v4031_v55, %v4968_v21 }
 0x280   :  { %1134 = vrot.lane.b32.xlu1 %v1094_v51, %s2756_s16  ;;  %v2568_v16 = vpack.c.bf16 %v1301_v34, %v1300_v17  ;;  %v1099_v51 = vmul.f32 %v3968_v20, %v4968_v21  ;;  %v2079_v41 = vadd.f32 %v3937_v11, %v1983_v37  ;;  %v2099_v11 = vmul.f32 %v3803_v49, %v4896_v32 }
 0x281   :  { %v2080_v53 = vadd.f32 %v4220_v18, %v1984_v23  ;;  %v1909_v18 = vmul.f32 %v3803_v49, %v4893_v45  ;;  %v460_v23 = vmul.f32 %v3785_v27, %v4918_v35  ;;  %v2010_v32 = vmul.f32 %v4031_v55, %v4969_v22 }
 0x282   :  { %v4297_v19 = vpop.permute.xlu0 %754  ;;  %2569 = vmatpush3.bf16.msra.mxu0 %v2568_v16  ;;  %v714_v37 = vmul.f32 %v3785_v27, %v4922_v46 }
 0x283   :  { %4966 = vst [vmem:[#allocation59_spill] sm:$0xff] %v4297_v19  ;;  %892 = vrot.lane.b32.xlu0 %v845_v39, %s2754_s14  ;;  %v4302_v0 = vpop.permute.xlu1 %1755  ;;  %2570 = vmatprep.subr.bf16.mxu0 %v4878_v62  ;;  %v2176_v34 = vadd.f32 %v4066_v31, %v2080_v53 }
 0x284   :  { %1575 = vrot.lane.b32.xlu1 %v1529_v5, %s2749_s26 }
 0x285   :  { %v2192_v16 = vadd.f32 %v2176_v34, %v4964_v13 }
 0x286   :  { %v4312_v36 = vpop.permute.xlu0 %1006 }
 0x287   :  { %1144 = vrot.lane.b32.xlu0 %v1099_v51, %s2756_s16  ;;  %v4317_v33 = vpop.permute.xlu1 %1943 }
 0x288   :  { %1763 = vrot.lane.b32.xlu1 %v1719_v50, %s2751_s28 }
 0x28a   :  { %v4323_v17 = vpop.permute.xlu0 %1479 }
 0x28b   :  { %1961 = vrot.lane.b32.xlu0 %v1914_v2, %s2754_s14  ;;  %v2132_v57 = vpop.permute.xlu1 %2131  ;;  %v4970_v2 = vld [vmem:[#allocation13_spill] sm:$0xff] }
 0x28c   :  { %v2175_v9 = vadd.f32 %v2132_v57, %v2079_v41  ;;  %1951 = vrot.lane.b32.xlu1 %v1909_v18, %s2754_s14  ;;  %v1101_v34 = vmul.f32 %v3968_v20, %v4970_v2  ;;  %v968_v41 = vmul.f32 %v3785_v27, %v4924_v8  ;;  %v2106_v57 = vmul.f32 %v4031_v55, %v4970_v2 }
 0x28e   :  { %v2191_v31 = vadd.f32 %v2175_v9, %v4964_v13  ;;  %v1668_v39 = vpop.permute.xlu0 %1667  ;;  %v4971_v9 = vld [vmem:[#allocation69_spill] sm:$0xff] }
 0x28f   :  { %2149 = vrot.lane.b32.xlu0 %v2104_v15, %s2756_s16  ;;  %v4337_v45 = vpop.permute.xlu1 %246  ;;  %v1397_v15 = vmul.f32 %v3803_v49, %v4971_v9 }
 0x290   :  { %2139 = vrot.lane.b32.xlu1 %v2099_v11, %s2756_s16  ;;  %v2592_v5 = vpack.c.bf16 %v2192_v16, %v2191_v31  ;;  %v1399_v16 = vmul.f32 %v3803_v49, %v3910_v61  ;;  %v1625_v31 = vmul.f32 %v3803_v49, %v4918_v35  ;;  %v1229_v35 = vcombine.high %v4010_v14, %v4010_v14 }
 0x292   :  { %2593 = vmatpush3.bf16.msra.mxu1 %v2592_v5  ;;  %v1856_v51 = vpop.permute.xlu0 %1855  ;;  %v1259_v14 = vrot.slane %v1229_v35, %v3093_v24 }
 0x293   :  { %1020 = vrot.lane.b32.xlu0 %v973_v28, %s2755_s15  ;;  %v4345_v13 = vpop.permute.xlu1 %498  ;;  %2594 = vmatprep.subr.bf16.mxu1 %v4878_v62  ;;  %v1509_v28 = vadd.f32 %v3900_v29, %v1397_v15 }
 0x294   :  { %506 = vrot.lane.b32.xlu1 %v460_v23, %s2750_s27 }
 0x296   :  { %v4357_v50 = vpop.permute.xlu0 %2043 }
 0x297   :  { %2057 = vrot.lane.b32.xlu0 %v2010_v32, %s2755_s15  ;;  %v4354_v53 = vpop.permute.xlu1 %750  ;;  %v1605_v32 = vadd.f32 %v4290_v3, %v1509_v28  ;;  %v2005_v3 = vmul.f32 %v3803_v49, %v4924_v8 }
 0x298   :  { %758 = vrot.lane.b32.xlu1 %v714_v37, %s2753_s29 }
 0x29a   :  { %v4373_v11 = vpop.permute.xlu0 %1285 }
 0x29b   :  { %1148 = vrot.lane.b32.xlu0 %v1101_v34, %s2756_s16  ;;  %v1003_v18 = vpop.permute.xlu1 %1002  ;;  %v1815_v34 = vmul.f32 %v3803_v49, %v4922_v46 }
 0x29c   :  { %1010 = vrot.lane.b32.xlu1 %v968_v41, %s2755_s15 }
 0x29e   :  { %v4387_v29 = vpop.permute.xlu0 %380 }
 0x29f   :  { %2153 = vrot.lane.b32.xlu0 %v2106_v57, %s2756_s16  ;;  %v1476_v5 = vpop.permute.xlu1 %1475 }
 0x2a0   :  { %v1511_v23 = vadd.f32 %v1476_v5, %v1399_v16  ;;  %1671 = vrot.lane.b32.xlu1 %v1625_v31, %s2750_s27  ;;  %v4972_v16 = vld [vmem:[#allocation6_spill] sm:$0xff] }
 0x2a1   :  { %v132_v46 = vmul.f32 %v3785_v27, %v4972_v16  ;;  %v133_v31 = vmul.f32 %v3968_v20, %v4972_v16  ;;  %v4973_v5 = vld [vmem:[#allocation38_spill] sm:$0xff]  ;;  %v4975_v27 = vld [vmem:[#allocation51_spill] sm:$0xff] }
 0x2a2   :  { %v1607_v37 = vadd.f32 %v4215_v26, %v1511_v23  ;;  %v4404_v23 = vpop.permute.xlu0 %632 }
 0x2a3   :  { %v1664_v41 = vpop.permute.xlu1 %1663  ;;  %v276_v28 = vadd.f32 %v4973_v5, %v132_v46 }
 0x2a4   :  { %v1701_v19 = vadd.f32 %v1664_v41, %v1605_v32  ;;  %1859 = vrot.lane.b32.xlu1 %v1815_v34, %s2753_s29  ;;  %v4385_v57 = vadd.f32 %v1668_v39, %v1607_v37  ;;  %v589_v34 = vmul.f32 %v3968_v20, %v4932_v30 }
 0x2a5   :  { %v404_v32 = vadd.f32 %v3795_v47, %v276_v28  ;;  %v843_v47 = vmul.f32 %v3968_v20, %v4934_v60  ;;  %v1097_v28 = vmul.f32 %v3968_v20, %v4936_v56 }
 0x2a6   :  { %v1797_v15 = vadd.f32 %v4227_v40, %v1701_v19  ;;  %v4974_v40 = vld [vmem:[#allocation71_spill] sm:$0xff] }
 0x2a7   :  { %v4392_v26 = vpop.permute.xlu1 %1851  ;;  %v277_v19 = vadd.f32 %v4974_v40, %v133_v31  ;;  %v4977_v31 = vld [vmem:[#allocation78_spill] sm:$0xff] }
 0x2a8   :  { %2047 = vrot.lane.b32.xlu1 %v2005_v3, %s2755_s15  ;;  %v4400_v39 = vadd.f32 %v1856_v51, %v1797_v15  ;;  %v4976_v51 = vld [vmem:[#allocation63_spill] sm:$0xff]  ;;  %v4415_v15 = vpop.permute.xlu0 %884 }
 0x2a9   :  { %v405_v37 = vadd.f32 %v4975_v27, %v277_v19  ;;  %v532_v35 = vadd.f32 %v4976_v51, %v404_v32  ;;  %v1394_v32 = vmul.f32 %v4031_v55, %v4972_v16 }
 0x2ab   :  { %v2040_v8 = vpop.permute.xlu1 %2039  ;;  %v533_v24 = vadd.f32 %v3932_v25, %v405_v37  ;;  %v660_v3 = vadd.f32 %v4038_v38, %v532_v35  ;;  %v1393_v38 = vmul.f32 %v3803_v49, %v4972_v16 }
 0x2ac   :  { %1289 = vperm.xlu1 %2697, %v1259_v14   ;;  %v4428_v40 = vpop.permute.xlu0 %1136 }
 0x2ad   :  { %v661_v14 = vadd.f32 %v4977_v31, %v533_v24  ;;  %v788_v25 = vadd.f32 %v3880_v7, %v660_v3  ;;  %v1722_v7 = vmul.f32 %v4031_v55, %v4932_v30 }
 0x2af   :  { %v4410_v41 = vpop.permute.xlu1 %1281  ;;  %v789_v5 = vadd.f32 %v4163_v43, %v661_v14  ;;  %v916_v27 = vadd.f32 %v4262_v48, %v788_v25  ;;  %v4978_v43 = vld [vmem:[#allocation43_spill] sm:$0xff]  ;;  %v4980_v48 = vld [vmem:[#allocation56_spill] sm:$0xff]  ;;  %v1912_v14 = vmul.f32 %v4031_v55, %v4934_v60 }
 0x2b0   :  { %636 = vrot.lane.b32.xlu1 %v589_v34, %s2751_s28  ;;  %v1505_v37 = vadd.f32 %v4978_v43, %v1393_v38  ;;  %v4979_v34 = vld [vmem:[#allocation77_spill] sm:$0xff]  ;;  %v4447_v16 = vpop.permute.xlu0 %1577 }
 0x2b1   :  { %v1506_v24 = vadd.f32 %v4979_v34, %v1394_v32  ;;  %v917_v51 = vadd.f32 %v3987_v4, %v789_v5  ;;  %v1044_v35 = vadd.f32 %v1003_v18, %v916_v27  ;;  %v4981_v18 = vld [vmem:[#allocation70_spill] sm:$0xff]  ;;  %v4982_v27 = vld [vmem:[#allocation81_spill] sm:$0xff]  ;;  %v4984_v34 = vld [vmem:[#allocation8_spill] sm:$0xff] }
 0x2b2   :  { %v1601_v49 = vadd.f32 %v3857_v58, %v1505_v37  ;;  %v4983_v43 = vld [vmem:[#allocation37_spill] sm:$0xff] }
 0x2b3   :  { %v4420_v46 = vpop.permute.xlu1 %376  ;;  %v1172_v31 = vadd.f32 %v4201_v52, %v1044_v35  ;;  %v1045_v30 = vadd.f32 %v4116_v10, %v917_v51  ;;  %v2102_v10 = vmul.f32 %v4031_v55, %v4936_v56 }
 0x2b4   :  { %888 = vrot.lane.b32.xlu1 %v843_v47, %s2754_s14  ;;  %v1602_v47 = vadd.f32 %v4980_v48, %v1506_v24  ;;  %v1697_v5 = vadd.f32 %v4981_v18, %v1601_v49  ;;  %v4462_v52 = vpop.permute.xlu0 %1765  ;;  %v717_v24 = vmul.f32 %v3968_v20, %v4948_v44  ;;  %v4985_v49 = vld [vmem:[#allocation44_spill] sm:$0xff] }
 0x2b5   :  { %v1302_v38 = vadd.f32 %v3950_v6, %v1172_v31  ;;  %v971_v31 = vmul.f32 %v3968_v20, %v4952_v42 }
 0x2b6   :  { %v1698_v4 = vadd.f32 %v3977_v63, %v1602_v47  ;;  %v1793_v58 = vadd.f32 %v4095_v12, %v1697_v5 }
 0x2b7   :  { %v4430_v19 = vpop.permute.xlu1 %628 }
 0x2b8   :  { %1140 = vrot.lane.b32.xlu1 %v1097_v28, %s2756_s16  ;;  %v1794_v63 = vadd.f32 %v4982_v27, %v1698_v4  ;;  %v1889_v12 = vadd.f32 %v4984_v34, %v1793_v58  ;;  %v4477_v35 = vpop.permute.xlu0 %1953  ;;  %v4987_v4 = vld [vmem:[#allocation47_spill] sm:$0xff] }
 0x2b9   :  { %v4988_v27 = vld [vmem:[#allocation35_spill] sm:$0xff] }
 0x2ba   :  { %v1890_v37 = vadd.f32 %v4983_v43, %v1794_v63  ;;  %v1985_v56 = vadd.f32 %v4317_v33, %v1889_v12  ;;  %v1818_v33 = vmul.f32 %v4031_v55, %v4948_v44  ;;  %v141_v63 = vmul.f32 %v3968_v20, %v4988_v27 }
 0x2bb   :  { %v4443_v3 = vpop.permute.xlu1 %880 }
 0x2bc   :  { %1769 = vrot.lane.b32.xlu1 %v1722_v7, %s2751_s28  ;;  %v1986_v48 = vadd.f32 %v4985_v49, %v1890_v37  ;;  %v2081_v47 = vadd.f32 %v2040_v8, %v1985_v56  ;;  %v4489_v5 = vpop.permute.xlu0 %2141  ;;  %v2008_v8 = vmul.f32 %v4031_v55, %v4952_v42 }
 0x2be   :  { %v2082_v18 = vadd.f32 %v4987_v4, %v1986_v48  ;;  %v4530_v4 = vld [vmem:[%s4761_s0 + $0x10] sm:$0xff] }
 0x2bf   :  { %v1133_v25 = vpop.permute.xlu1 %1132 }
 0x2c0   :  { %v1173_v28 = vadd.f32 %v1133_v25, %v1045_v30  ;;  %1957 = vrot.lane.b32.xlu1 %v1912_v14, %s2754_s14  ;;  %v4986_v14 = vld [vmem:[#allocation46_spill] sm:$0xff]  ;;  %v509_v12 = vpop.permute.xlu0 %508 }
 0x2c1   :  { %v2177_v25 = vadd.f32 %v4986_v14, %v2081_v47 }
 0x2c2   :  { %v1303_v32 = vadd.f32 %v3950_v6, %v1173_v28 }
 0x2c3   :  { %v4464_v60 = vpop.permute.xlu1 %1573 }
 0x2c4   :  { %2145 = vrot.lane.b32.xlu1 %v2102_v10, %s2756_s16  ;;  %v2571_v7 = vpack.c.bf16 %v1303_v32, %v1302_v38  ;;  %v139_v38 = vmul.f32 %v3968_v20, %v3910_v61  ;;  %v2193_v32 = vadd.f32 %v2177_v25, %v3950_v6  ;;  %v1398_v25 = vmul.f32 %v4031_v55, %v4971_v9 }
 0x2c6   :  { %2572 = vmatpush3.bf16.msra.mxu0 %v2571_v7  ;;  %v4989_v7 = vld [vmem:[#allocation20_spill] sm:$0xff] }
 0x2c7   :  { %v4472_v51 = vpop.permute.xlu1 %1761  ;;  %2573 = vmatprep.subr.bf16.mxu0 %v4878_v62  ;;  %v283_v43 = vadd.f32 %v4989_v7, %v139_v38  ;;  %v1402_v38 = vmul.f32 %v4031_v55, %v4988_v27 }
 0x2c8   :  { %764 = vrot.lane.b32.xlu1 %v717_v24, %s2753_s29 }
 0x2c9   :  { %v411_v42 = vadd.f32 %v4420_v46, %v283_v43 }
 0x2cb   :  { %v4482_v30 = vpop.permute.xlu1 %1949 }
 0x2cc   :  { %1016 = vrot.lane.b32.xlu1 %v971_v31, %s2755_s15  ;;  %v4520_v31 = vpop.permute.xlu0 %760 }
 0x2cf   :  { %v2138_v28 = vpop.permute.xlu1 %2137 }
 0x2d0   :  { %v2178_v58 = vadd.f32 %v2138_v28, %v2082_v18  ;;  %1865 = vrot.lane.b32.xlu1 %v1818_v33, %s2753_s29  ;;  %v4990_v33 = vld [vmem:[#allocation67_spill] sm:$0xff] }
 0x2d1   :  { %v1510_v28 = vadd.f32 %v4990_v33, %v1398_v25 }
 0x2d2   :  { %v2194_v10 = vadd.f32 %v2178_v58, %v3950_v6  ;;  %v4507_v6 = vld [vmem:[%s4761_s0] sm:$0xff]  ;;  %v4538_v58 = vpop.permute.xlu0 %1012 }
 0x2d3   :  { %v253_v44 = vpop.permute.xlu1 %252  ;;  %v844_v56 = vmul.f32 %v4507_v6, %v4965_v54 }
 0x2d4   :  { %v285_v37 = vadd.f32 %v253_v44, %v141_v63  ;;  %2053 = vrot.lane.b32.xlu1 %v2008_v8, %s2755_s15  ;;  %v2595_v34 = vpack.c.bf16 %v2194_v10, %v2193_v32  ;;  %v1400_v8 = vmul.f32 %v4031_v55, %v3910_v61  ;;  %v2103_v32 = vmul.f32 %v4530_v4, %v4968_v21  ;;  %v4991_v63 = vld [vmem:[#allocation26_spill] sm:$0xff] }
 0x2d5   :  { %v4992_v44 = vld [vmem:[#allocation14_spill] sm:$0xff] }
 0x2d6   :  { %v413_v24 = vadd.f32 %v4387_v29, %v285_v37  ;;  %2596 = vmatpush3.bf16.msra.mxu1 %v2595_v34  ;;  %v1098_v29 = vmul.f32 %v4507_v6, %v4968_v21  ;;  %v1606_v7 = vadd.f32 %v4992_v44, %v1510_v28  ;;  %v4993_v37 = vld [vmem:[#allocation24_spill] sm:$0xff]  ;;  %v2009_v28 = vmul.f32 %v4530_v4, %v4969_v22 }
 0x2d7   :  { %v505_v49 = vpop.permute.xlu1 %504  ;;  %2597 = vmatprep.subr.bf16.mxu1 %v4878_v62  ;;  %v135_v34 = vmul.f32 %v3968_v20, %v4993_v37  ;;  %v134_v20 = vmul.f32 %v4507_v6, %v4993_v37 }
 0x2d8   :  { %v539_v48 = vadd.f32 %v505_v49, %v411_v42  ;;  %890 = vrot.lane.b32.xlu1 %v844_v56, %s2754_s14  ;;  %v4513_v47 = vadd.f32 %v509_v12, %v413_v24  ;;  %v972_v24 = vmul.f32 %v4507_v6, %v4969_v22  ;;  %v1674_v56 = vpop.permute.xlu0 %1673  ;;  %v4994_v49 = vld [vmem:[#allocation18_spill] sm:$0xff]  ;;  %v1100_v22 = vmul.f32 %v4507_v6, %v4970_v2 }
 0x2da   :  { %v4516_v46 = vadd.f32 %v4404_v23, %v539_v48  ;;  %v1913_v23 = vmul.f32 %v4530_v4, %v4965_v54  ;;  %v1512_v54 = vadd.f32 %v4991_v63, %v1400_v8  ;;  %v279_v48 = vadd.f32 %v4994_v49, %v135_v34 }
 0x2db   :  { %v4522_v14 = vpop.permute.xlu1 %756 }
 0x2dc   :  { %1142 = vrot.lane.b32.xlu1 %v1098_v29, %s2756_s16  ;;  %v1608_v12 = vadd.f32 %v4464_v60, %v1512_v54  ;;  %v4995_v29 = vld [vmem:[#allocation61_spill] sm:$0xff]  ;;  %v138_v54 = vmul.f32 %v4507_v6, %v3910_v61  ;;  %v2105_v61 = vmul.f32 %v4530_v4, %v4970_v2  ;;  %v1396_v2 = vmul.f32 %v4031_v55, %v4993_v37 }
 0x2dd   :  { %v1702_v25 = vadd.f32 %v4995_v29, %v1606_v7  ;;  %v4998_v7 = vld [vmem:[#allocation19_spill] sm:$0xff]  ;;  %v5002_v29 = vld [vmem:[#allocation16_spill] sm:$0xff]  ;;  %v1395_v55 = vmul.f32 %v4530_v4, %v4993_v37 }
 0x2de   :  { %v282_v34 = vadd.f32 %v4337_v45, %v138_v54 }
 0x2df   :  { %v4534_v18 = vpop.permute.xlu1 %1008  ;;  %v1798_v60 = vadd.f32 %v4472_v51, %v1702_v25 }
 0x2e0   :  { %1959 = vrot.lane.b32.xlu1 %v1913_v23, %s2754_s14  ;;  %v410_v45 = vadd.f32 %v5002_v29, %v282_v34 }
 0x2e3   :  { %v1482_v10 = vpop.permute.xlu1 %1481 }
 0x2e4   :  { %v1514_v43 = vadd.f32 %v1482_v10, %v1402_v38  ;;  %2147 = vrot.lane.b32.xlu1 %v2103_v32, %s2756_s16  ;;  %v4996_v38 = vld [vmem:[#allocation62_spill] sm:$0xff]  ;;  %v4997_v10 = vld [vmem:[#allocation76_spill] sm:$0xff] }
 0x2e5   :  { %v278_v32 = vadd.f32 %v4996_v38, %v134_v20  ;;  %v407_v63 = vadd.f32 %v4997_v10, %v279_v48  ;;  %v5004_v38 = vld [vmem:[#allocation11_spill] sm:$0xff] }
 0x2e6   :  { %v1610_v42 = vadd.f32 %v4447_v16, %v1514_v43  ;;  %v4999_v43 = vld [vmem:[#allocation42_spill] sm:$0xff] }
 0x2e7   :  { %v1670_v21 = vpop.permute.xlu1 %1669  ;;  %v406_v51 = vadd.f32 %v4998_v7, %v278_v32 }
 0x2e8   :  { %v1704_v23 = vadd.f32 %v1670_v21, %v1608_v12  ;;  %1018 = vrot.lane.b32.xlu1 %v972_v24, %s2755_s15  ;;  %v4558_v33 = vadd.f32 %v1674_v56, %v1610_v42  ;;  %v140_v42 = vmul.f32 %v4507_v6, %v4988_v27  ;;  %v5000_v24 = vld [vmem:[#allocation7_spill] sm:$0xff] }
 0x2e9   :  { %v5001_v21 = vld [vmem:[#allocation83_spill] sm:$0xff] }
 0x2ea   :  { %v4564_v16 = vadd.f32 %v4462_v52, %v1704_v23  ;;  %v535_v52 = vadd.f32 %v4999_v43, %v407_v63  ;;  %v534_v49 = vadd.f32 %v5001_v21, %v406_v51  ;;  %v284_v48 = vadd.f32 %v4276_v1, %v140_v42  ;;  %v5003_v23 = vld [vmem:[#allocation22_spill] sm:$0xff]  ;;  %v5005_v63 = vld [vmem:[#allocation85_spill] sm:$0xff] }
 0x2eb   :  { %v1858_v8 = vpop.permute.xlu1 %1857  ;;  %v538_v1 = vadd.f32 %v4288_v59, %v410_v45  ;;  %v1508_v54 = vadd.f32 %v5005_v63, %v1396_v2  ;;  %v2759_v43 = vmov 0.0   ;;  %v5012_v2 = vld [vmem:[#allocation39_spill] sm:$0xff] }
 0x2ec   :  { %v4572_v44 = vadd.f32 %v1858_v8, %v1798_v60  ;;  %2055 = vrot.lane.b32.xlu1 %v2009_v28, %s2755_s15  ;;  %v663_v56 = vadd.f32 %v5000_v24, %v535_v52  ;;  %v662_v20 = vadd.f32 %v5003_v23, %v534_v49  ;;  %v44_v28 = vld [vmem:[%s4765_s4] sm:$0xff]  ;;  %2506 = vmatprep.mubr.msk.f32.mxu0 %vm2758_vm0, %v2759_v43  ;;  %v4605_v52 = vpop.permute.xlu0 %1861  ;;  %v5010_v49 = vld [vmem:[#allocation30_spill] sm:$0xff] }
 0x2ed   :  { %2541 = vmatprep.mubr.msk.f32.mxu1 %vm2758_vm0, %v2759_v43 }
 0x2ee   :  { %v790_v8 = vadd.f32 %v4354_v53, %v662_v20  ;;  %v791_v32 = vadd.f32 %v5004_v38, %v663_v56  ;;  %v5006_v53 = vld [vmem:[#allocation21_spill] sm:$0xff]  ;;  %v5009_v56 = vld [vmem:[#allocation15_spill] sm:$0xff]  ;;  %v5011_v20 = vld [vmem:[#allocation48_spill] sm:$0xff] }
 0x2ef   :  { %v2046_v12 = vpop.permute.xlu1 %2045 }
 0x2f0   :  { %1146 = vrot.lane.b32.xlu1 %v1100_v22, %s2756_s16  ;;  %v919_v7 = vadd.f32 %v4443_v3, %v791_v32  ;;  %v918_v34 = vadd.f32 %v5006_v53, %v790_v8  ;;  %v5007_v22 = vld [vmem:[#allocation68_spill] sm:$0xff]  ;;  %v4617_v45 = vpop.permute.xlu0 %2049  ;;  %v5014_v53 = vld [vmem:[#allocation66_spill] sm:$0xff] }
 0x2f1   :  { %v1507_v42 = vadd.f32 %v5007_v22, %v1395_v55  ;;  %v5008_v3 = vld [vmem:[#allocation80_spill] sm:$0xff] }
 0x2f2   :  { %v1047_v59 = vadd.f32 %v4534_v18, %v919_v7  ;;  %v1604_v24 = vadd.f32 %v5008_v3, %v1508_v54  ;;  %v1046_v37 = vadd.f32 %v4312_v36, %v918_v34  ;;  %v1401_v18 = vmul.f32 %v4530_v4, %v4988_v27  ;;  %v5013_v4 = vld [vmem:[#allocation54_spill] sm:$0xff] }
 0x2f3   :  { %v379_v25 = vpop.permute.xlu1 %378  ;;  %v1603_v21 = vadd.f32 %v5009_v56, %v1507_v42 }
 0x2f4   :  { %v412_v60 = vadd.f32 %v379_v25, %v284_v48  ;;  %2151 = vrot.lane.b32.xlu1 %v2105_v61, %s2756_s16  ;;  %v1700_v48 = vadd.f32 %v5010_v49, %v1604_v24  ;;  %v1175_v29 = vadd.f32 %v4428_v40, %v1047_v59  ;;  %v1513_v38 = vadd.f32 %v4323_v17, %v1401_v18  ;;  %v4627_v54 = vpop.permute.xlu0 %634 }
 0x2f6   :  { %v1796_v8 = vadd.f32 %v5012_v2, %v1700_v48  ;;  %v1305_v32 = vadd.f32 %v4410_v41, %v1175_v29 }
 0x2f7   :  { %v631_v10 = vpop.permute.xlu1 %630 }
 0x2f8   :  { %v4601_v51 = vadd.f32 %v631_v10, %v538_v1  ;;  %1314 = vperm.xlu1 %2697, %v44_v28   ;;  %v1699_v28 = vadd.f32 %v5011_v20, %v1603_v21  ;;  %v1892_v7 = vadd.f32 %v5013_v4, %v1796_v8  ;;  %v4637_v59 = vpop.permute.xlu0 %886  ;;  %v5019_v4 = vld [vmem:[#allocation57_spill] sm:$0xff] }
 0x2fa   :  { %v1795_v36 = vadd.f32 %v4302_v0, %v1699_v28  ;;  %v1988_v17 = vadd.f32 %v4482_v30, %v1892_v7  ;;  %v5016_v28 = vld [vmem:[#allocation41_spill] sm:$0xff] }
 0x2fb   :  { %v4610_v61 = vpop.permute.xlu1 %882 }
 0x2fc   :  { %v1891_v27 = vadd.f32 %v4392_v26, %v1795_v36  ;;  %v2084_v0 = vadd.f32 %v2046_v12, %v1988_v17  ;;  %v1139_v56 = vpop.permute.xlu0 %1138 }
 0x2fe   :  { %v1987_v34 = vadd.f32 %v5014_v53, %v1891_v27  ;;  %v2180_v42 = vadd.f32 %v4489_v5, %v2084_v0 }
 0x2ff   :  { %v1135_v25 = vpop.permute.xlu1 %1134 }
 0x300   :  { %v1174_v23 = vadd.f32 %v1135_v25, %v1046_v37  ;;  %v2083_v26 = vadd.f32 %v4357_v50, %v1987_v34  ;;  %v2196_v21 = vadd.f32 %v2180_v42, %v4410_v41  ;;  %v4645_v12 = vpop.permute.xlu0 %1767  ;;  %v136_v25 = vmul.f32 %v4507_v6, %v4971_v9  ;;  %v5021_v34 = vld [vmem:[#allocation59_spill] sm:$0xff] }
 0x302   :  { %v1304_v1 = vadd.f32 %v4410_v41, %v1174_v23  ;;  %v5015_v23 = vld [vmem:[#allocation82_spill] sm:$0xff] }
 0x303   :  { %v1576_v40 = vpop.permute.xlu1 %1575  ;;  %v280_v20 = vadd.f32 %v5015_v23, %v136_v25 }
 0x304   :  { %v1609_v10 = vadd.f32 %v1576_v40, %v1513_v38  ;;  %v2574_v63 = vpack.c.bf16 %v1305_v32, %v1304_v1  ;;  %v4648_v37 = vpop.permute.xlu0 %1955  ;;  %v5017_v32 = vld [vmem:[#allocation49_spill] sm:$0xff]  ;;  %v5018_v40 = vld [vmem:[#allocation84_spill] sm:$0xff] }
 0x305   :  { %v408_v1 = vadd.f32 %v5017_v32, %v280_v20 }
 0x306   :  { %2575 = vmatpush3.bf16.msra.mxu0 %v2574_v63 }
 0x307   :  { %v1764_v43 = vpop.permute.xlu1 %1763  ;;  %2576 = vmatprep.subr.bf16.mxu0 %v4878_v62  ;;  %v536_v6 = vadd.f32 %v4345_v13, %v408_v1 }
 0x308   :  { %v4634_v55 = vadd.f32 %v1764_v43, %v4385_v57  ;;  %v2144_v8 = vpop.permute.xlu0 %2143 }
 0x309   :  { %v664_v7 = vadd.f32 %v5019_v4, %v536_v6 }
 0x30b   :  { %v1952_v22 = vpop.permute.xlu1 %1951  ;;  %v792_v0 = vadd.f32 %v5021_v34, %v664_v7  ;;  %v1896_v34 = vadd.f32 %v4605_v52, %v4564_v16 }
 0x30c   :  { %v4663_v27 = vpop.permute.xlu0 %762  ;;  %v1989_v23 = vadd.f32 %v1952_v22, %v4400_v39 }
 0x30f   :  { %v2140_v3 = vpop.permute.xlu1 %2139 }
 0x310   :  { %v2179_v24 = vadd.f32 %v2140_v3, %v2083_v26  ;;  %v1015_v42 = vpop.permute.xlu0 %1014  ;;  %v920_v3 = vadd.f32 %v4610_v61, %v792_v0 }
 0x312   :  { %v2195_v30 = vadd.f32 %v2179_v24, %v4410_v41  ;;  %v2713_v41 = vld [vmem:[%s4761_s0 + $0x8] sm:$0xff] }
 0x313   :  { %v507_v49 = vpop.permute.xlu1 %506 }
 0x314   :  { %v4643_v57 = vadd.f32 %v507_v49, %v412_v60  ;;  %v2598_v48 = vpack.c.bf16 %v2196_v21, %v2195_v30  ;;  %v137_v60 = vmul.f32 %v2713_v41, %v4971_v9  ;;  %v5020_v9 = vld [vmem:[#allocation17_spill] sm:$0xff]  ;;  %v4674_v30 = vpop.permute.xlu0 %1863 }
 0x316   :  { %2599 = vmatpush3.bf16.msra.mxu1 %v2598_v48  ;;  %v281_v2 = vadd.f32 %v5016_v28, %v137_v60 }
 0x317   :  { %v759_v29 = vpop.permute.xlu1 %758  ;;  %2600 = vmatprep.subr.bf16.mxu1 %v4878_v62 }
 0x318   :  { %v409_v36 = vadd.f32 %v5018_v40, %v281_v2  ;;  %v2052_v41 = vpop.permute.xlu0 %2051 }
 0x31b   :  { %v1011_v5 = vpop.permute.xlu1 %1010 }
 0x31c   :  { %v1048_v24 = vadd.f32 %v1011_v5, %v920_v3 }
 0x31e   :  { %v1176_v49 = vadd.f32 %v1139_v56, %v1048_v24 }
 0x31f   :  { %v1672_v50 = vpop.permute.xlu1 %1671 }
 0x320   :  { %v4656_v18 = vadd.f32 %v1672_v50, %v1609_v10  ;;  %v537_v10 = vadd.f32 %v5020_v9, %v409_v36 }
 0x322   :  { %v665_v17 = vadd.f32 %v4430_v19, %v537_v10  ;;  %v1306_v19 = vadd.f32 %v4373_v11, %v1176_v49 }
 0x323   :  { %v1860_v38 = vpop.permute.xlu1 %1859 }
 0x324   :  { %v793_v53 = vadd.f32 %v4522_v14, %v665_v17 }
 0x326   :  { %v921_v13 = vadd.f32 %v4415_v15, %v793_v53  ;;  %v1990_v15 = vadd.f32 %v4477_v35, %v4572_v44  ;;  %v1895_v53 = vadd.f32 %v1860_v38, %v4634_v55 }
 0x327   :  { %v2048_v63 = vpop.permute.xlu1 %2047 }
 0x328   :  { %v1049_v48 = vadd.f32 %v4538_v58, %v921_v13  ;;  %v2085_v5 = vadd.f32 %v2048_v63, %v1989_v23  ;;  %v4683_v58 = vpop.permute.xlu0 %1293  ;;  %v2086_v28 = vadd.f32 %v4617_v45, %v1990_v15  ;;  %v794_v63 = vadd.f32 %v759_v29, %v4601_v51 }
 0x329   :  { %v795_v45 = vadd.f32 %v4520_v31, %v4516_v46  ;;  %v1991_v46 = vadd.f32 %v4648_v37, %v1895_v53 }
 0x32a   :  { %v2181_v56 = vadd.f32 %v2144_v8, %v2085_v5  ;;  %v922_v9 = vadd.f32 %v4637_v59, %v794_v63 }
 0x32b   :  { %v4667_v43 = vpop.permute.xlu1 %1289  ;;  %v2087_v16 = vadd.f32 %v2052_v41, %v1991_v46  ;;  %v1801_v41 = vadd.f32 %v4645_v12, %v4656_v18 }
 0x32c   :  { %v2197_v1 = vadd.f32 %v2181_v56, %v4373_v11  ;;  %v893_v22 = vpop.permute.xlu0 %892  ;;  %v1050_v3 = vadd.f32 %v1015_v42, %v922_v9 }
 0x32f   :  { %v637_v26 = vpop.permute.xlu1 %636 }
 0x330   :  { %v1145_v44 = vpop.permute.xlu0 %1144 }
 0x333   :  { %v889_v21 = vpop.permute.xlu1 %888 }
 0x334   :  { %v1962_v8 = vpop.permute.xlu0 %1961  ;;  %v923_v7 = vadd.f32 %v889_v21, %v795_v45 }
 0x337   :  { %v1141_v50 = vpop.permute.xlu1 %1140 }
 0x338   :  { %v1177_v25 = vadd.f32 %v1141_v50, %v1049_v48  ;;  %v2150_v17 = vpop.permute.xlu0 %2149  ;;  %v669_v48 = vadd.f32 %v637_v26, %v4513_v47 }
 0x33a   :  { %v1307_v14 = vadd.f32 %v4373_v11, %v1177_v25  ;;  %v668_v25 = vadd.f32 %v4627_v54, %v4643_v57 }
 0x33b   :  { %v1770_v60 = vpop.permute.xlu1 %1769 }
 0x33c   :  { %v2577_v61 = vpack.c.bf16 %v1307_v14, %v1306_v19  ;;  %v1021_v21 = vpop.permute.xlu0 %1020  ;;  %v1802_v42 = vadd.f32 %v1770_v60, %v4558_v33  ;;  %v796_v33 = vadd.f32 %v4663_v27, %v668_v25  ;;  %v50_v25 = vld [vmem:[%s4768_s7 + $0x18] sm:$0xff] }
 0x33e   :  { %2578 = vmatpush3.bf16.msra.mxu0 %v2577_v61 }
 0x33f   :  { %v1958_v20 = vpop.permute.xlu1 %1957  ;;  %2579 = vmatprep.subr.bf16.mxu0 %v4878_v62 }
 0x340   :  { %v1992_v51 = vadd.f32 %v1958_v20, %v1896_v34  ;;  %v2058_v19 = vpop.permute.xlu0 %2057 }
 0x343   :  { %v2146_v2 = vpop.permute.xlu1 %2145 }
 0x344   :  { %v2182_v32 = vadd.f32 %v2146_v2, %v2086_v28  ;;  %v1149_v60 = vpop.permute.xlu0 %1148  ;;  %v1897_v2 = vadd.f32 %v4674_v30, %v1801_v41  ;;  %v43_v30 = vld [vmem:[%s4764_s3] sm:$0xff] }
 0x346   :  { %v2198_v39 = vadd.f32 %v2182_v32, %v4373_v11 }
 0x347   :  { %v765_v40 = vpop.permute.xlu1 %764 }
 0x348   :  { %v2601_v36 = vpack.c.bf16 %v2198_v39, %v2197_v1  ;;  %v797_v38 = vadd.f32 %v765_v40, %v669_v48 }
 0x34a   :  { %2602 = vmatpush3.bf16.msra.mxu1 %v2601_v36  ;;  %v925_v14 = vadd.f32 %v893_v22, %v797_v38  ;;  %v2154_v22 = vpop.permute.xlu0 %2153 }
 0x34b   :  { %v1017_v35 = vpop.permute.xlu1 %1016  ;;  %2603 = vmatprep.subr.bf16.mxu1 %v4878_v62 }
 0x34c   :  { %v1051_v11 = vadd.f32 %v1017_v35, %v923_v7  ;;  %v1053_v5 = vadd.f32 %v1021_v21, %v925_v14  ;;  %v45_v21 = vld [vmem:[%s4766_s5] sm:$0xff] }
 0x34d   :  { %v51_v14 = vld [vmem:[%s4768_s7 + $0x20] sm:$0xff] }
 0x34e   :  { %v1179_v0 = vadd.f32 %v1145_v44, %v1051_v11  ;;  %v1181_v57 = vadd.f32 %v1149_v60, %v1053_v5 }
 0x34f   :  { %v1866_v6 = vpop.permute.xlu1 %1865 }
 0x350   :  { %v1309_v31 = vadd.f32 %v4667_v43, %v1179_v0  ;;  %v1898_v23 = vadd.f32 %v1866_v6, %v1802_v42  ;;  %v1311_v27 = vadd.f32 %v4683_v58, %v1181_v57 }
 0x352   :  { %v1994_v20 = vadd.f32 %v1962_v8, %v1898_v23  ;;  %v52_v23 = vld [vmem:[%s4768_s7 + $0x28] sm:$0xff] }
 0x353   :  { %v2054_v4 = vpop.permute.xlu1 %2053 }
 0x354   :  { %v2088_v24 = vadd.f32 %v2054_v4, %v1992_v51  ;;  %v2090_v28 = vadd.f32 %v2058_v19, %v1994_v20 }
 0x356   :  { %v2184_v50 = vadd.f32 %v2150_v17, %v2088_v24  ;;  %v2186_v12 = vadd.f32 %v2154_v22, %v2090_v28 }
 0x357   :  { %v891_v10 = vpop.permute.xlu1 %890 }
 0x358   :  { %v2200_v61 = vadd.f32 %v2184_v50, %v4667_v43  ;;  %v924_v54 = vadd.f32 %v891_v10, %v796_v33  ;;  %v2202_v6 = vadd.f32 %v2186_v12, %v4683_v58 }
 0x35b   :  { %v1143_v13 = vpop.permute.xlu1 %1142 }
 0x35c   :  { %v1178_v29 = vadd.f32 %v1143_v13, %v1050_v3 }
 0x35e   :  { %v1308_v59 = vadd.f32 %v4667_v43, %v1178_v29 }
 0x35f   :  { %v1960_v49 = vpop.permute.xlu1 %1959 }
 0x360   :  { %v2580_v55 = vpack.c.bf16 %v1309_v31, %v1308_v59  ;;  %v1993_v1 = vadd.f32 %v1960_v49, %v1897_v2 }
 0x362   :  { %2581 = vmatpush3.bf16.msra.mxu0 %v2580_v55  ;;  %v46_v55 = vld [vmem:[%s4767_s6] sm:$0xff] }
 0x363   :  { %v2148_v52 = vpop.permute.xlu1 %2147  ;;  %2582 = vmatprep.subr.bf16.mxu0 %v4878_v62 }
 0x364   :  { %v2183_v37 = vadd.f32 %v2148_v52, %v2087_v16  ;;  %v47_v16 = vld [vmem:[%s4768_s7] sm:$0xff]  ;;  %v48_v52 = vld [vmem:[%s4768_s7 + $0x8] sm:$0xff] }
 0x365   :  { %v2609_v42 = vpack.c.bf16 %v48_v52, %v47_v16 }
 0x366   :  { %v2199_v47 = vadd.f32 %v2183_v37, %v4667_v43  ;;  %v49_v37 = vld [vmem:[%s4768_s7 + $0x10] sm:$0xff] }
 0x367   :  { %v1019_v26 = vpop.permute.xlu1 %1018  ;;  %v2613_v19 = vpack.c.bf16 %v50_v25, %v49_v37 }
 0x368   :  { %v2604_v15 = vpack.c.bf16 %v2200_v61, %v2199_v47  ;;  %v1052_v43 = vadd.f32 %v1019_v26, %v924_v54  ;;  %v2617_v61 = vpack.c.bf16 %v52_v23, %v51_v14  ;;  %v53_v47 = vld [vmem:[%s4768_s7 + $0x30] sm:$0xff]  ;;  %s2760_s7 = smov [#allocation2]  }
 0x369   :  { %s2408_s9 = sshll.u32 %s2760_s7, 4  ;;  %s2409_s9 = int_to_ptr.vmem [resolvable:$true] %s2408_s9 }
 0x36a   :  { %2605 = vmatpush3.bf16.msra.mxu1 %v2604_v15  ;;  %s2715_s23 = scalar_lea.vmem %s2409_s9, 256  ;;  %p2720_p1 = scmp.lt.s32.totalorder %s2409_s9, %s2409_s9 }
 0x36b   :  { %v2056_v56 = vpop.permute.xlu1 %2055  ;;  %2606 = vmatprep.subr.bf16.mxu1 %v4878_v62  ;;  %p2716_p0 = scmp.ne.s32.totalorder %s2409_s9, %s2715_s23  ;;  %p2721_p2 = scmp.lt.s32.totalorder %s2715_s23, %s2715_s23 }
 0x36c   :  { %v2089_v18 = vadd.f32 %v2056_v56, %v1993_v1 }
 0x36d   :  { %p2722_p3 = por %p2721_p2, %p2720_p1 }
 0x36f   :  { %v1147_v32 = vpop.permute.xlu1 %1146  ;;  %p2723_p4 = pnand %p2722_p3, %p2716_p0 }
 0x370   :  { %v1180_v39 = vadd.f32 %v1147_v32, %v1052_v43 }
 0x372   :  { %v1310_v40 = vadd.f32 %v4683_v58, %v1180_v39 }
 0x373   :  { %v2152_v36 = vpop.permute.xlu1 %2151 }
 0x374   :  { %v2185_v35 = vadd.f32 %v2152_v36, %v2089_v18  ;;  %v2583_v44 = vpack.c.bf16 %v1311_v27, %v1310_v40 }
 0x376   :  { %v2201_v62 = vadd.f32 %v2185_v35, %v4683_v58  ;;  %2584 = vmatpush3.bf16.msra.mxu0 %v2583_v44 }
 0x377   :  { %v1315_v4 = vpop.permute.xlu1 %1314  ;;  %2610 = vmatprep.subr.bf16.mxu0 %v2609_v42 }
 0x378   :  { %v2607_v63 = vpack.c.bf16 %v2202_v6, %v2201_v62 }
 0x379   :  { %2507 = vmatmul.mubr.f32.vlgmr.msra.gmra.mrb[0].mxu0 %v43_v30 }
 0x37a   :  { %2608 = vmatpush3.bf16.msra.mxu1 %v2607_v63  ;;  %2612 = vmatpush3.bf16.msra.mxu0 %v2609_v42 }
 0x37b   :  { %2614 = vmatprep.subr.bf16.mxu0 %v2613_v19 }
 0x37d   :  { %2542 = vmatmul.mubr.f32.vlgmr.msra.gmra.mrb[0].mxu1 %v43_v30 }
 0x37e   :  { %2616 = vmatpush3.bf16.msra.mxu0 %v2613_v19 }
 0x37f   :  { %2618 = vmatprep.subr.bf16.mxu0 %v2617_v61 }
 0x382   :  { %2620 = vmatpush3.bf16.msra.mxu0 %v2617_v61 }
 0x383   :  { %2556 = vmatprep.subr.mxu0 %v53_v47 }
 0x386   :  { %2557 = vmatpush3.msra.mxu0 %v53_v47 }
 0x44c   :  { %v1383_v45 = vpop.f32.mrb[0].mxu0 }
 0x44d   :  { %v2508_v8 = vpop.f32.mrb[1].mxu0  ;;  %v1384_v9 = vadd.f32 %v1383_v45, %v1315_v4 }
 0x450   :  { %v2269_v7 = vpop.f32.mrb[0].mxu1 }
 0x451   :  { %v2270_v11 = vadd.f32 %v2269_v7, %v1315_v4  ;;  %v2543_v10 = vpop.f32.mrb[1].mxu1 }
 0x453   :  { %v2273_v17 = vadd.f32 %v2270_v11, %v1384_v9 }
 0x455   :  { %v2275_v53 = vsel %vm2274_vm1, %v2273_v17, 0.0 }
 0x456   :  { %2276 = vadd.xlane.f32.xlu0 %v2275_v53 }
 0x4e3   :  { %v2277_v34 = vpop.xlane.xlu0 %2276 }
 0x4e4   :  { %v2278_v0 = vmul.f32 0.008928572, %v2277_v34 }
 0x4e6   :  { %v2279_v3 = vsub.f32 %v1384_v9, %v2278_v0  ;;  %v2281_v58 = vsub.f32 %v2270_v11, %v2278_v0 }
 0x4e8   :  { %v2280_v13 = vmul.f32 %v2279_v3, %v2279_v3  ;;  %v2282_v51 = vmul.f32 %v2281_v58, %v2281_v58 }
 0x4ea   :  { %v2283_v29 = vadd.f32 %v2282_v51, %v2280_v13 }
 0x4ec   :  { %v2284_v46 = vsel %vm2274_vm1, %v2283_v29, 0.0 }
 0x4ed   :  { %2285 = vadd.xlane.f32.xlu1 %v2284_v46 }
 0x57a   :  { %v2286_v31 = vpop.xlane.xlu1 %2285 }
 0x57b   :  { %v2287_v24 = vmul.f32 0.008928572, %v2286_v31 }
 0x57d   :  { %v2288_v59 = vadd.f32 1e-05, %v2287_v24 }
 0x57f   :  { %2699 = vrsqrt.f32 %v2288_v59 }
 0x589   :  { %v2700_v49 = vpop.eup %2699 }
 0x58a   :  { %v2290_v48 = vmul.f32 %v2700_v49, %v45_v21 }
 0x58c   :  { %2295 = vperm.xlu0 %2696, %v2290_v48   ;;  %v2291_v38 = vmul.f32 %v2290_v48, %v2278_v0 }
 0x58e   :  { %v2292_v50 = vsub.f32 %v46_v55, %v2291_v38 }
 0x590   :  { %2301 = vperm.xlu1 %2697, %v2292_v50  }
 0x60b   :  { %v2296_v26 = vpop.permute.xlu0 %2295 }
 0x60c   :  { %v2298_v15 = vmul.f32 %v2296_v26, %v1384_v9  ;;  %v2311_v41 = vmul.f32 %v2296_v26, %v2270_v11 }
 0x60f   :  { %v2302_v5 = vpop.permute.xlu1 %2301 }
 0x610   :  { %v2304_v20 = vadd.f32 %v2302_v5, %v2298_v15  ;;  %v2312_v33 = vadd.f32 %v2311_v41, %v2302_v5 }
 0x612   :  { %v2306_v60 = vmin.f32 %v2304_v20, 0.0  ;;  %v2314_v56 = vmin.f32 %v2312_v33, 0.0  ;;  %vm2305_vm2 = vcmp.gt.f32.partialorder %v2304_v20, 0.0  ;;  %vm2313_vm3 = vcmp.gt.f32.partialorder %v2312_v33, 0.0 }
 0x614   :  { %v2307_v54 = vmul.f32 1.442695, %v2306_v60  ;;  %v2315_v57 = vmul.f32 1.442695, %v2314_v56 }
 0x616   :  { %2701 = vpow2.f32 %v2307_v54 }
 0x617   :  { %2703 = vpow2.f32 %v2315_v57 }
 0x620   :  { %v2702_v28 = vpop.eup %2701 }
 0x621   :  { %v2704_v2 = vpop.eup %2703  ;;  %v2427_v43 = vadd.f32 -1.0, %v2702_v28 }
 0x622   :  { %v2428_v32 = vadd.f32 -1.0, %v2704_v2 }
 0x623   :  { %v2310_v1 = vsel %vm2305_vm2, %v2304_v20, %v2427_v43 }
 0x624   :  { %v2318_v39 = vsel %vm2313_vm3, %v2312_v33, %v2428_v32  ;;  %2558 = vmatprep.mubr.msk.f32.mxu0 %vm2274_vm1, %v2310_v1 }
 0x625   :  { %2559 = vmatmul.mubr.msk.f32.vlgmr.msra.gmra.mrb[2].mxu0 %vm2274_vm1, %v2318_v39 }
 0x6f8   :  { %v2560_v22 = vpop.f32.mrb[2].mxu0 }
 0x6f9   :  { %2402 = vst.msk [vmem:[#allocation2 + $0x8] sm:$0xff] %vm2400_vm4, %v2560_v22  ;;  %v2391_v12 = vpop.f32.mrb[3].mxu0 }
 0x6fa   :  { %2401 = vst.msk [vmem:[#allocation2] sm:$0xff] %vm2400_vm4, %v2391_v12 }
 0x6fb   :  { %2726 = shalt.err (!%p2723_p4)
}
 0x6fc   :  { %s2727_s28 = scalar_lea.hbm %s4769_s8, 256 }
 0x6fd   :  { %p2728_p5 = scmp.ne.s32.totalorder %s4769_s8, %s2727_s28  ;;  %p2731_p6 = scmp.lt.u32.totalorder %s2727_s28, %s4769_s8 }
 0x6ff   :  { %p2733_p7 = pnand %p2731_p6, %p2728_p5 }
 0x701   :  { %2736 = shalt.err (!%p2733_p7)
}
 0x702   :  { %s2761_s0 = smov 128   ;;  %s2762_s12 = smov 8  }
 0x703   :  { %2414 = dma.vmem_to_hbm [thread:$0]  %s2409_s9, 256, %s4769_s8, [#allocation3], %s2761_s0, %s2761_s0, %s2762_s12  }
 0x704   :  { %2737 = dma.done.wait [#allocation3], 256  }
 0x705   :  { %2738 = vsyncadd [#allocation3], 4294967040 }
 0x706   :  { %2418 = vsyncpa [#allocation3], 1 }

</bundles_post_ra>
